<compile_context>
chip_gen: v7x
topology: tpu7x:2x2x1
jax: 0.10.0
libtpu: 0.0.40
codegen_flags: <defaults>
</compile_context>

<pallas_src>
import functools

import jax
import jax.numpy as jnp
from jax.experimental import pallas as pl
from jax.experimental.pallas import tpu as pltpu


# -----------------------------------------------------------------------------
# Pallas kernel: one full CLCRN GRU cell step for `block_b` batch elements,
# with the batch block folded into the lane dimension.
# -----------------------------------------------------------------------------
def _clcrn_cell_kernel(x_ref, h_ref, conv_ref,
                       wx_ru_ref, wh_ru_ref, b_ru_ref,
                       wx_c_ref, wh_c_ref, b_c_ref,
                       out_ref, *, max_view, block_b, num_units, nonlinearity):
    f32 = jnp.float32
    K = max_view
    BU = block_b * num_units

    X = x_ref[0]                      # (N, block_b*F)  batch folded into lanes
    H = h_ref[0]                      # (N, block_b*U)
    H32 = H.astype(f32)

    w_dt = wx_ru_ref.dtype
    conv_dt = conv_ref.dtype

    def _wcast(a):   # feed the MXU in the weight dtype only when params are low precision
        return a.astype(w_dt) if w_dt != jnp.float32 else a

    def _ccast(a):   # likewise for the conv-kernel dtype (no-op in the default f32 path)
        return a.astype(conv_dt) if conv_dt != jnp.float32 else a

    # Gate / candidate pre-activations.  Bias terms enter once per grid step:
    # the (1, 2*BU)/(1, BU) rows broadcast on the first accumulate below.
    ru_pre = b_ru_ref[...].astype(f32)          # (1, 2*BU) -> [r-head | u-head]
    c_pre = b_c_ref[...].astype(f32)            # (1, BU)

    # ---- pass 1: aggregate x/h per view (batched in lanes) and project
    # immediately, so each aggregated stream dies inside its loop iteration.
    for k in range(K):
        conv_k = conv_ref[k]                                          # (N, N)
        xa = jnp.dot(conv_k, _ccast(X), preferred_element_type=f32)   # (N, block_b*F)
        ha = jnp.dot(conv_k, _ccast(H), preferred_element_type=f32)   # (N, BU)
        ru_pre = (ru_pre
                  + jnp.dot(_wcast(xa), wx_ru_ref[k], preferred_element_type=f32)
                  + jnp.dot(_wcast(ha), wh_ru_ref[k], preferred_element_type=f32))
        c_pre = c_pre + jnp.dot(_wcast(xa), wx_c_ref[k], preferred_element_type=f32)

    r = jax.nn.sigmoid(ru_pre[:, :BU])          # (N, BU)  lane-aligned when BU % 128 == 0
    u = jax.nn.sigmoid(ru_pre[:, BU:])          # (N, BU)

    # ---- pass 2: re-aggregate the gated state, still batched in lanes -------
    rh = r * H32                                 # (N, BU), f32 gate product
    for k in range(K):
        rha = jnp.dot(conv_ref[k], _ccast(rh), preferred_element_type=f32)
        c_pre = c_pre + jnp.dot(_wcast(rha), wh_c_ref[k], preferred_element_type=f32)

    c = jnp.tanh(c_pre) if nonlinearity == 'tanh' else jnp.maximum(c_pre, 0.0)

    # Single lane-dense store of the new hidden state.
    out_ref[0] = (u * H32 + (1.0 - u) * c).astype(out_ref.dtype)


# -----------------------------------------------------------------------------
# Parameter preparation (hoist out of any per-time-step scan!)
# -----------------------------------------------------------------------------
def _choose_block_b(batch, num_units):
    # Smallest batch fold whose folded hidden width is lane-dense (>= 128):
    # keeps stores unmasked and the aggregation free dim MXU-filled, while
    # leaving as many grid steps as possible (megacore / pipelining) and keeping
    # the block-diagonal projection weights small (they grow ~ block_b^2).
    divisors = [d for d in range(1, batch + 1) if batch % d == 0]
    dense = [d for d in divisors if d * num_units >= 128]
    return min(dense) if dense else batch


def _block_diag(w, nb):
    # (K, din, dout) -> (K, nb*din, nb*dout) with per-batch diagonal blocks.
    K, din, dout = w.shape
    eye = jnp.eye(nb, dtype=w.dtype)
    return jnp.einsum('ab,kio->kaibo', eye, w).reshape(K, nb * din, nb * dout)


def prepare_clcrn_params(conv_ker, w_ru, b_ru, w_c, b_c, *,
                         max_view, num_units, num_feature, block_b,
                         param_dtype=None):
    """Fold the GraphConv weights for the Pallas kernel.

    Call ONCE (outside any lax.scan over time): the strided slicing and
    block-diagonal construction would otherwise be re-materialized by XLA at
    every time step.
    """
    K, U, F, nb = max_view, num_units, num_feature, block_b
    E = F + U
    assert conv_ker.shape[0] == K and conv_ker.shape[1] == conv_ker.shape[2]
    assert w_ru.shape == (K * E, 2 * U) and w_c.shape == (K * E, U)
    assert b_ru.shape == (2 * U,) and b_c.shape == (U,)

    # Rows of W are ordered (view k, embedding e), embedding = [x(F), h(U)];
    # W_ru output columns are ordered [r(U), u(U)].
    w_ru3 = w_ru.reshape(K, E, 2 * U)
    w_c3 = w_c.reshape(K, E, U)
    wx_r, wx_u = w_ru3[:, :F, :U], w_ru3[:, :F, U:]
    wh_r, wh_u = w_ru3[:, F:, :U], w_ru3[:, F:, U:]
    wx_c, wh_c = w_c3[:, :F, :], w_c3[:, F:, :]

    # Block-diagonal per-batch projection weights, gate heads fused along lanes.
    # Output columns are head-major then batch-major, so r/u slice at BU-aligned
    # offsets and share the column layout of the lane-folded hidden state.
    wx_ru_blk = jnp.concatenate(
        [_block_diag(wx_r, nb), _block_diag(wx_u, nb)], axis=-1)   # (K, nb*F, 2*nb*U)
    wh_ru_blk = jnp.concatenate(
        [_block_diag(wh_r, nb), _block_diag(wh_u, nb)], axis=-1)   # (K, nb*U, 2*nb*U)
    wx_c_blk = _block_diag(wx_c, nb)                               # (K, nb*F, nb*U)
    wh_c_blk = _block_diag(wh_c, nb)                               # (K, nb*U, nb*U)

    b_ru_f = jnp.concatenate(
        [jnp.tile(b_ru[:U], nb), jnp.tile(b_ru[U:], nb)]).reshape(1, 2 * nb * U)
    b_c_f = jnp.tile(b_c, nb).reshape(1, nb * U)

    conv = conv_ker
    if param_dtype is not None:
        conv = conv.astype(param_dtype)
        wx_ru_blk = wx_ru_blk.astype(param_dtype)
        wh_ru_blk = wh_ru_blk.astype(param_dtype)
        wx_c_blk = wx_c_blk.astype(param_dtype)
        wh_c_blk = wh_c_blk.astype(param_dtype)

    return (conv, wx_ru_blk, wh_ru_blk, b_ru_f, wx_c_blk, wh_c_blk, b_c_f)


# -----------------------------------------------------------------------------
# Kernel launcher
# -----------------------------------------------------------------------------
def clcrn_cell_apply(params, inputs, hx, *, max_view, num_units, block_b,
                     nonlinearity='tanh'):
    conv, wx_ru_blk, wh_ru_blk, b_ru_f, wx_c_blk, wh_c_blk, b_c_f = params
    B, N, F = inputs.shape
    U = num_units
    K = max_view
    assert hx.shape == (B, N, U)
    assert conv.shape == (K, N, N)
    assert B % block_b == 0
    nb = block_b
    steps = B // nb
    BF, BU = nb * F, nb * U

    # Fold the batch block into the lane (free) dimension: node-major layout.
    x_f = inputs.reshape(steps, nb, N, F).transpose(0, 2, 1, 3).reshape(steps, N, BF)
    h_f = hx.reshape(steps, nb, N, U).transpose(0, 2, 1, 3).reshape(steps, N, BU)

    kernel = functools.partial(_clcrn_cell_kernel, max_view=K, block_b=nb,
                               num_units=U, nonlinearity=nonlinearity)

    itemsize = jnp.dtype(inputs.dtype).itemsize
    w_itemsize = jnp.dtype(wx_ru_blk.dtype).itemsize
    conv_itemsize = jnp.dtype(conv.dtype).itemsize

    # Advisory cost estimate (helps XLA schedule this call inside a scan).
    flops = int(2 * K * B * N * N * (F + 2 * U)
                + 6 * K * N * BU * (BF + BU) * steps)
    transcendentals = int(3 * B * N * U)
    w_bytes = ((wx_ru_blk.size + wh_ru_blk.size + wx_c_blk.size + wh_c_blk.size)
               * w_itemsize + (b_ru_f.size + b_c_f.size) * 4)
    conv_bytes = conv.size * conv_itemsize
    bytes_accessed = int(itemsize * (inputs.size + hx.size + B * N * U)
                         + conv_bytes + w_bytes)

    # VMEM footprint: conv/weights have constant index maps (fetched only once
    # by the pipeline) but their buffers are still double-allocated; x/h/out
    # blocks are double-buffered; f32 intermediates (accumulators, aggregated
    # streams) live in VMEM too.  Raise the scoped limit, generation-aware,
    # only when actually needed (never for the small self-test below).
    io_bytes = N * (BF + BU) * itemsize + N * BU * itemsize
    interm_bytes = 8 * N * BU * 4
    resident = 2 * (conv_bytes + w_bytes + io_bytes) + interm_bytes
    vmem_limit = None
    if resident > 24 * 1024 * 1024:
        try:
            vmem_cap = int(pltpu.get_tpu_info().vmem_capacity_bytes)
        except Exception:
            vmem_cap = 64 * 1024 * 1024          # conservative (v7x per-core)
        vmem_limit = int(min(resident + (8 << 20), int(0.85 * vmem_cap)))
    # TODO(synk): row-tile conv_ker (second grid axis) for very large N on v7x.

    const3 = lambda b: (0, 0, 0)
    const2 = lambda b: (0, 0)

    out_f = pl.pallas_call(
        kernel,
        out_shape=jax.ShapeDtypeStruct((steps, N, BU), inputs.dtype),
        grid=(steps,),
        in_specs=[
            pl.BlockSpec((1, N, BF), lambda b: (b, 0, 0)),        # x (lane-folded)
            pl.BlockSpec((1, N, BU), lambda b: (b, 0, 0)),        # h (lane-folded)
            pl.BlockSpec((K, N, N), const3),                      # conv_ker
            pl.BlockSpec((K, BF, 2 * BU), const3),                # Wx -> [r|u]
            pl.BlockSpec((K, BU, 2 * BU), const3),                # Wh -> [r|u]
            pl.BlockSpec((1, 2 * BU), const2),                    # b_[r|u]
            pl.BlockSpec((K, BF, BU), const3),                    # Wx -> c
            pl.BlockSpec((K, BU, BU), const3),                    # Wh -> c
            pl.BlockSpec((1, BU), const2),                        # b_c
        ],
        out_specs=pl.BlockSpec((1, N, BU), lambda b: (b, 0, 0)),  # lane-dense
        compiler_params=pltpu.CompilerParams(
            dimension_semantics=("parallel",),
            vmem_limit_bytes=vmem_limit),
        cost_estimate=pl.CostEstimate(flops=flops,
                                      transcendentals=transcendentals,
                                      bytes_accessed=bytes_accessed),
    )(x_f, h_f, conv, wx_ru_blk, wh_ru_blk, b_ru_f, wx_c_blk, wh_c_blk, b_c_f)

    # Unfold the lane-dense output back to the PyTorch layout (B, N, U).
    return out_f.reshape(steps, N, nb, U).transpose(0, 2, 1, 3).reshape(B, N, U)


def clcrn_cell(inputs, hx, conv_ker, w_ru, b_ru, w_c, b_c, *,
               max_view, num_units, block_b=None, nonlinearity='tanh',
               param_dtype=None):
    """Convenience wrapper: prepare params + run the cell once."""
    B, N, F = inputs.shape
    U = hx.shape[-1]
    assert U == num_units
    if block_b is None:
        block_b = _choose_block_b(B, U)
    assert B % block_b == 0, f"block_b={block_b} must divide batch={B}"
    params = prepare_clcrn_params(conv_ker, w_ru, b_ru, w_c, b_c,
                                  max_view=max_view, num_units=U,
                                  num_feature=F, block_b=block_b,
                                  param_dtype=param_dtype)
    return clcrn_cell_apply(params, inputs, hx, max_view=max_view,
                            num_units=U, block_b=block_b,
                            nonlinearity=nonlinearity)


# -----------------------------------------------------------------------------
# Pure-JAX reference (mirrors the PyTorch forward: concat-form GraphConv)
# -----------------------------------------------------------------------------
def clcrn_cell_ref(inputs, hx, conv_ker, w_ru, b_ru, w_c, b_c,
                   *, max_view, num_units, nonlinearity='tanh'):
    def gconv(feat, w, b):
        views = [jnp.einsum('nm,bme->bne', conv_ker[k], feat)
                 for k in range(max_view)]
        z = jnp.concatenate(views, axis=-1)
        return jnp.einsum('bne,eo->bno', z, w) + b

    xh = jnp.concatenate([inputs, hx], axis=2)
    value = jax.nn.sigmoid(gconv(xh, w_ru, b_ru))
    r, u = value[..., :num_units], value[..., num_units:]
    xrh = jnp.concatenate([inputs, r * hx], axis=2)
    c_pre = gconv(xrh, w_c, b_c)
    c = jnp.tanh(c_pre) if nonlinearity == 'tanh' else jnp.maximum(c_pre, 0.0)
    return u * hx + (1.0 - u) * c


# -----------------------------------------------------------------------------
if __name__ == "__main__":
    # Small, module-consistent shapes.  B=8 so the default heuristic picks
    # block_b=4 -> grid=(2,) with a 128-lane folded hidden state.
    B = 8                 # batch
    N = 16                # node_num
    F = 4                 # num_feature (per-node input dim)
    U = 32                # num_units (rnn hidden)
    K = 3                 # max_view
    E = F + U             # num_embedding

    key = jax.random.PRNGKey(0)
    k1, k2, k3, k4, k5, k6, k7 = jax.random.split(key, 7)

    inputs = jax.random.normal(k1, (B, N, F), dtype=jnp.float32)
    hx = jax.random.normal(k2, (B, N, U), dtype=jnp.float32)
    conv_raw = jax.random.uniform(k3, (K, N, N), dtype=jnp.float32)
    conv_ker = conv_raw / jnp.sum(conv_raw, axis=-1, keepdims=True)

    w_ru = 0.1 * jax.random.normal(k4, (K * E, 2 * U), dtype=jnp.float32)
    b_ru = 0.1 * jax.random.normal(k5, (2 * U,), dtype=jnp.float32)
    w_c = 0.1 * jax.random.normal(k6, (K * E, U), dtype=jnp.float32)
    b_c = 0.1 * jax.random.normal(k7, (U,), dtype=jnp.float32)

    ref = clcrn_cell_ref(inputs, hx, conv_ker, w_ru, b_ru, w_c, b_c,
                         max_view=K, num_units=U)

    # Default heuristic (block_b=4, grid=(2,)), plus explicit block sizes that
    # exercise the single-step (block_b=B) and sub-128-lane (block_b=2) paths.
    for bb in (None, 8, 2):
        out = clcrn_cell(inputs, hx, conv_ker, w_ru, b_ru, w_c, b_c,
                         max_view=K, num_units=U, block_b=bb)
        out = jax.block_until_ready(out)
        assert out.shape == (B, N, U)
        err = jnp.max(jnp.abs(out - ref))
        assert jnp.allclose(out, ref, atol=1e-5, rtol=1e-5), \
            f"block_b={bb}: max err {err}"

    print("KERNEL_OK")
</pallas_src>

<mosaic_0001>
module attributes {stable_mosaic.version = 11 : i64} {
  func.func @_clcrn_cell_kernel(%arg0: i32, %arg1: memref<1x16x16xf32, #tpu.memory_space<vmem>>, %arg2: memref<1x16x128xf32, #tpu.memory_space<vmem>>, %arg3: memref<3x16x16xf32, #tpu.memory_space<vmem>>, %arg4: memref<3x16x256xf32, #tpu.memory_space<vmem>>, %arg5: memref<3x128x256xf32, #tpu.memory_space<vmem>>, %arg6: memref<1x256xf32, #tpu.memory_space<vmem>>, %arg7: memref<3x16x128xf32, #tpu.memory_space<vmem>>, %arg8: memref<3x128x128xf32, #tpu.memory_space<vmem>>, %arg9: memref<1x128xf32, #tpu.memory_space<vmem>>, %arg10: memref<1x16x128xf32, #tpu.memory_space<vmem>>) attributes {dimension_semantics = [#tpu.dimension_semantics<parallel>], iteration_bounds = array<i64: 2>, scalar_prefetch = 0 : i64, scratch_operands = 0 : i64, tpu.core_type = #tpu.core_type<tc>, window_params = [{transform_indices = @transform_0, window_bounds = array<i64: 1, 16, 16>}, {transform_indices = @transform_1, window_bounds = array<i64: 1, 16, 128>}, {pipeline_mode = #tpu.pipeline_mode<synchronous>, transform_indices = @transform_2, window_bounds = array<i64: 3, 16, 16>}, {pipeline_mode = #tpu.pipeline_mode<synchronous>, transform_indices = @transform_3, window_bounds = array<i64: 3, 16, 256>}, {pipeline_mode = #tpu.pipeline_mode<synchronous>, transform_indices = @transform_4, window_bounds = array<i64: 3, 128, 256>}, {pipeline_mode = #tpu.pipeline_mode<synchronous>, transform_indices = @transform_5, window_bounds = array<i64: 1, 256>}, {pipeline_mode = #tpu.pipeline_mode<synchronous>, transform_indices = @transform_6, window_bounds = array<i64: 3, 16, 128>}, {pipeline_mode = #tpu.pipeline_mode<synchronous>, transform_indices = @transform_7, window_bounds = array<i64: 3, 128, 128>}, {pipeline_mode = #tpu.pipeline_mode<synchronous>, transform_indices = @transform_8, window_bounds = array<i64: 1, 128>}, {transform_indices = @transform_9, window_bounds = array<i64: 1, 16, 128>}]} {
    %c0 = arith.constant 0 : index
    %c0_0 = arith.constant 0 : index
    %c0_1 = arith.constant 0 : index
    %0 = vector.load %arg1[%c0, %c0_0, %c0_1] : memref<1x16x16xf32, #tpu.memory_space<vmem>>, vector<1x16x16xf32>
    %1 = vector.shape_cast %0 : vector<1x16x16xf32> to vector<16x16xf32>
    %c0_2 = arith.constant 0 : index
    %c0_3 = arith.constant 0 : index
    %c0_4 = arith.constant 0 : index
    %2 = vector.load %arg2[%c0_2, %c0_3, %c0_4] : memref<1x16x128xf32, #tpu.memory_space<vmem>>, vector<1x16x128xf32>
    %3 = vector.shape_cast %2 : vector<1x16x128xf32> to vector<16x128xf32>
    %c0_5 = arith.constant 0 : index
    %c0_6 = arith.constant 0 : index
    %4 = vector.load %arg6[%c0_5, %c0_6] : memref<1x256xf32, #tpu.memory_space<vmem>>, vector<1x256xf32>
    %c0_7 = arith.constant 0 : index
    %c0_8 = arith.constant 0 : index
    %5 = vector.load %arg9[%c0_7, %c0_8] : memref<1x128xf32, #tpu.memory_space<vmem>>, vector<1x128xf32>
    %c0_9 = arith.constant 0 : index
    %c0_10 = arith.constant 0 : index
    %c0_11 = arith.constant 0 : index
    %6 = vector.load %arg3[%c0_9, %c0_10, %c0_11] : memref<3x16x16xf32, #tpu.memory_space<vmem>>, vector<1x16x16xf32>
    %7 = vector.shape_cast %6 : vector<1x16x16xf32> to vector<16x16xf32>
    %cst = arith.constant dense<0.000000e+00> : vector<16x16xf32>
    %8 = tpu.matmul %7, %1, %cst {dimension_numbers = #tpu.dot_dimension_numbers<[1], [0], [0], [1], [0, 0, 1, 1], [], []>} : vector<16x16xf32>, vector<16x16xf32>, vector<16x16xf32> -> vector<16x16xf32>
    %cst_12 = arith.constant dense<0.000000e+00> : vector<16x128xf32>
    %9 = tpu.matmul %7, %3, %cst_12 {dimension_numbers = #tpu.dot_dimension_numbers<[1], [0], [0], [1], [0, 0, 1, 1], [], []>} : vector<16x16xf32>, vector<16x128xf32>, vector<16x128xf32> -> vector<16x128xf32>
    %c0_13 = arith.constant 0 : index
    %c0_14 = arith.constant 0 : index
    %c0_15 = arith.constant 0 : index
    %10 = vector.load %arg4[%c0_13, %c0_14, %c0_15] : memref<3x16x256xf32, #tpu.memory_space<vmem>>, vector<1x16x256xf32>
    %11 = vector.shape_cast %10 : vector<1x16x256xf32> to vector<16x256xf32>
    %cst_16 = arith.constant dense<0.000000e+00> : vector<16x256xf32>
    %12 = tpu.matmul %8, %11, %cst_16 {dimension_numbers = #tpu.dot_dimension_numbers<[1], [0], [0], [1], [0, 0, 1, 1], [], []>} : vector<16x16xf32>, vector<16x256xf32>, vector<16x256xf32> -> vector<16x256xf32>
    %13 = vector.broadcast %4 : vector<1x256xf32> to vector<16x256xf32>
    %14 = arith.addf %13, %12 : vector<16x256xf32>
    %c0_17 = arith.constant 0 : index
    %c0_18 = arith.constant 0 : index
    %c0_19 = arith.constant 0 : index
    %15 = vector.load %arg5[%c0_17, %c0_18, %c0_19] : memref<3x128x256xf32, #tpu.memory_space<vmem>>, vector<1x128x256xf32>
    %16 = vector.shape_cast %15 : vector<1x128x256xf32> to vector<128x256xf32>
    %cst_20 = arith.constant dense<0.000000e+00> : vector<16x256xf32>
    %17 = tpu.matmul %9, %16, %cst_20 {dimension_numbers = #tpu.dot_dimension_numbers<[1], [0], [0], [1], [0, 0, 1, 1], [], []>} : vector<16x128xf32>, vector<128x256xf32>, vector<16x256xf32> -> vector<16x256xf32>
    %18 = arith.addf %14, %17 : vector<16x256xf32>
    %c0_21 = arith.constant 0 : index
    %c0_22 = arith.constant 0 : index
    %c0_23 = arith.constant 0 : index
    %19 = vector.load %arg7[%c0_21, %c0_22, %c0_23] : memref<3x16x128xf32, #tpu.memory_space<vmem>>, vector<1x16x128xf32>
    %20 = vector.shape_cast %19 : vector<1x16x128xf32> to vector<16x128xf32>
    %cst_24 = arith.constant dense<0.000000e+00> : vector<16x128xf32>
    %21 = tpu.matmul %8, %20, %cst_24 {dimension_numbers = #tpu.dot_dimension_numbers<[1], [0], [0], [1], [0, 0, 1, 1], [], []>} : vector<16x16xf32>, vector<16x128xf32>, vector<16x128xf32> -> vector<16x128xf32>
    %22 = vector.broadcast %5 : vector<1x128xf32> to vector<16x128xf32>
    %23 = arith.addf %22, %21 : vector<16x128xf32>
    %c1 = arith.constant 1 : index
    %c0_25 = arith.constant 0 : index
    %c0_26 = arith.constant 0 : index
    %24 = vector.load %arg3[%c1, %c0_25, %c0_26] : memref<3x16x16xf32, #tpu.memory_space<vmem>>, vector<1x16x16xf32>
    %25 = vector.shape_cast %24 : vector<1x16x16xf32> to vector<16x16xf32>
    %cst_27 = arith.constant dense<0.000000e+00> : vector<16x16xf32>
    %26 = tpu.matmul %25, %1, %cst_27 {dimension_numbers = #tpu.dot_dimension_numbers<[1], [0], [0], [1], [0, 0, 1, 1], [], []>} : vector<16x16xf32>, vector<16x16xf32>, vector<16x16xf32> -> vector<16x16xf32>
    %cst_28 = arith.constant dense<0.000000e+00> : vector<16x128xf32>
    %27 = tpu.matmul %25, %3, %cst_28 {dimension_numbers = #tpu.dot_dimension_numbers<[1], [0], [0], [1], [0, 0, 1, 1], [], []>} : vector<16x16xf32>, vector<16x128xf32>, vector<16x128xf32> -> vector<16x128xf32>
    %c1_29 = arith.constant 1 : index
    %c0_30 = arith.constant 0 : index
    %c0_31 = arith.constant 0 : index
    %28 = vector.load %arg4[%c1_29, %c0_30, %c0_31] : memref<3x16x256xf32, #tpu.memory_space<vmem>>, vector<1x16x256xf32>
    %29 = vector.shape_cast %28 : vector<1x16x256xf32> to vector<16x256xf32>
    %cst_32 = arith.constant dense<0.000000e+00> : vector<16x256xf32>
    %30 = tpu.matmul %26, %29, %cst_32 {dimension_numbers = #tpu.dot_dimension_numbers<[1], [0], [0], [1], [0, 0, 1, 1], [], []>} : vector<16x16xf32>, vector<16x256xf32>, vector<16x256xf32> -> vector<16x256xf32>
    %31 = arith.addf %18, %30 : vector<16x256xf32>
    %c1_33 = arith.constant 1 : index
    %c0_34 = arith.constant 0 : index
    %c0_35 = arith.constant 0 : index
    %32 = vector.load %arg5[%c1_33, %c0_34, %c0_35] : memref<3x128x256xf32, #tpu.memory_space<vmem>>, vector<1x128x256xf32>
    %33 = vector.shape_cast %32 : vector<1x128x256xf32> to vector<128x256xf32>
    %cst_36 = arith.constant dense<0.000000e+00> : vector<16x256xf32>
    %34 = tpu.matmul %27, %33, %cst_36 {dimension_numbers = #tpu.dot_dimension_numbers<[1], [0], [0], [1], [0, 0, 1, 1], [], []>} : vector<16x128xf32>, vector<128x256xf32>, vector<16x256xf32> -> vector<16x256xf32>
    %35 = arith.addf %31, %34 : vector<16x256xf32>
    %c1_37 = arith.constant 1 : index
    %c0_38 = arith.constant 0 : index
    %c0_39 = arith.constant 0 : index
    %36 = vector.load %arg7[%c1_37, %c0_38, %c0_39] : memref<3x16x128xf32, #tpu.memory_space<vmem>>, vector<1x16x128xf32>
    %37 = vector.shape_cast %36 : vector<1x16x128xf32> to vector<16x128xf32>
    %cst_40 = arith.constant dense<0.000000e+00> : vector<16x128xf32>
    %38 = tpu.matmul %26, %37, %cst_40 {dimension_numbers = #tpu.dot_dimension_numbers<[1], [0], [0], [1], [0, 0, 1, 1], [], []>} : vector<16x16xf32>, vector<16x128xf32>, vector<16x128xf32> -> vector<16x128xf32>
    %39 = arith.addf %23, %38 : vector<16x128xf32>
    %c2 = arith.constant 2 : index
    %c0_41 = arith.constant 0 : index
    %c0_42 = arith.constant 0 : index
    %40 = vector.load %arg3[%c2, %c0_41, %c0_42] : memref<3x16x16xf32, #tpu.memory_space<vmem>>, vector<1x16x16xf32>
    %41 = vector.shape_cast %40 : vector<1x16x16xf32> to vector<16x16xf32>
    %cst_43 = arith.constant dense<0.000000e+00> : vector<16x16xf32>
    %42 = tpu.matmul %41, %1, %cst_43 {dimension_numbers = #tpu.dot_dimension_numbers<[1], [0], [0], [1], [0, 0, 1, 1], [], []>} : vector<16x16xf32>, vector<16x16xf32>, vector<16x16xf32> -> vector<16x16xf32>
    %cst_44 = arith.constant dense<0.000000e+00> : vector<16x128xf32>
    %43 = tpu.matmul %41, %3, %cst_44 {dimension_numbers = #tpu.dot_dimension_numbers<[1], [0], [0], [1], [0, 0, 1, 1], [], []>} : vector<16x16xf32>, vector<16x128xf32>, vector<16x128xf32> -> vector<16x128xf32>
    %c2_45 = arith.constant 2 : index
    %c0_46 = arith.constant 0 : index
    %c0_47 = arith.constant 0 : index
    %44 = vector.load %arg4[%c2_45, %c0_46, %c0_47] : memref<3x16x256xf32, #tpu.memory_space<vmem>>, vector<1x16x256xf32>
    %45 = vector.shape_cast %44 : vector<1x16x256xf32> to vector<16x256xf32>
    %cst_48 = arith.constant dense<0.000000e+00> : vector<16x256xf32>
    %46 = tpu.matmul %42, %45, %cst_48 {dimension_numbers = #tpu.dot_dimension_numbers<[1], [0], [0], [1], [0, 0, 1, 1], [], []>} : vector<16x16xf32>, vector<16x256xf32>, vector<16x256xf32> -> vector<16x256xf32>
    %47 = arith.addf %35, %46 : vector<16x256xf32>
    %c2_49 = arith.constant 2 : index
    %c0_50 = arith.constant 0 : index
    %c0_51 = arith.constant 0 : index
    %48 = vector.load %arg5[%c2_49, %c0_50, %c0_51] : memref<3x128x256xf32, #tpu.memory_space<vmem>>, vector<1x128x256xf32>
    %49 = vector.shape_cast %48 : vector<1x128x256xf32> to vector<128x256xf32>
    %cst_52 = arith.constant dense<0.000000e+00> : vector<16x256xf32>
    %50 = tpu.matmul %43, %49, %cst_52 {dimension_numbers = #tpu.dot_dimension_numbers<[1], [0], [0], [1], [0, 0, 1, 1], [], []>} : vector<16x128xf32>, vector<128x256xf32>, vector<16x256xf32> -> vector<16x256xf32>
    %51 = arith.addf %47, %50 : vector<16x256xf32>
    %c2_53 = arith.constant 2 : index
    %c0_54 = arith.constant 0 : index
    %c0_55 = arith.constant 0 : index
    %52 = vector.load %arg7[%c2_53, %c0_54, %c0_55] : memref<3x16x128xf32, #tpu.memory_space<vmem>>, vector<1x16x128xf32>
    %53 = vector.shape_cast %52 : vector<1x16x128xf32> to vector<16x128xf32>
    %cst_56 = arith.constant dense<0.000000e+00> : vector<16x128xf32>
    %54 = tpu.matmul %42, %53, %cst_56 {dimension_numbers = #tpu.dot_dimension_numbers<[1], [0], [0], [1], [0, 0, 1, 1], [], []>} : vector<16x16xf32>, vector<16x128xf32>, vector<16x128xf32> -> vector<16x128xf32>
    %55 = arith.addf %39, %54 : vector<16x128xf32>
    %56 = vector.extract_strided_slice %51 {offsets = [0, 0], sizes = [16, 128], strides = [1, 1]} : vector<16x256xf32> to vector<16x128xf32>
    %57 = arith.negf %56 : vector<16x128xf32>
    %58 = math.exp %57 : vector<16x128xf32>
    %cst_57 = arith.constant 1.000000e+00 : f32
    %59 = vector.broadcast %cst_57 : f32 to vector<16x128xf32>
    %60 = arith.addf %59, %58 : vector<16x128xf32>
    %61 = arith.divf %59, %60 : vector<16x128xf32>
    %62 = vector.extract_strided_slice %51 {offsets = [0, 128], sizes = [16, 128], strides = [1, 1]} : vector<16x256xf32> to vector<16x128xf32>
    %63 = arith.negf %62 : vector<16x128xf32>
    %64 = math.exp %63 : vector<16x128xf32>
    %cst_58 = arith.constant 1.000000e+00 : f32
    %65 = vector.broadcast %cst_58 : f32 to vector<16x128xf32>
    %66 = arith.addf %65, %64 : vector<16x128xf32>
    %67 = arith.divf %65, %66 : vector<16x128xf32>
    %68 = arith.mulf %61, %3 : vector<16x128xf32>
    %c0_59 = arith.constant 0 : index
    %c0_60 = arith.constant 0 : index
    %c0_61 = arith.constant 0 : index
    %69 = vector.load %arg3[%c0_59, %c0_60, %c0_61] : memref<3x16x16xf32, #tpu.memory_space<vmem>>, vector<1x16x16xf32>
    %70 = vector.shape_cast %69 : vector<1x16x16xf32> to vector<16x16xf32>
    %cst_62 = arith.constant dense<0.000000e+00> : vector<16x128xf32>
    %71 = tpu.matmul %70, %68, %cst_62 {dimension_numbers = #tpu.dot_dimension_numbers<[1], [0], [0], [1], [0, 0, 1, 1], [], []>} : vector<16x16xf32>, vector<16x128xf32>, vector<16x128xf32> -> vector<16x128xf32>
    %c0_63 = arith.constant 0 : index
    %c0_64 = arith.constant 0 : index
    %c0_65 = arith.constant 0 : index
    %72 = vector.load %arg8[%c0_63, %c0_64, %c0_65] : memref<3x128x128xf32, #tpu.memory_space<vmem>>, vector<1x128x128xf32>
    %73 = vector.shape_cast %72 : vector<1x128x128xf32> to vector<128x128xf32>
    %cst_66 = arith.constant dense<0.000000e+00> : vector<16x128xf32>
    %74 = tpu.matmul %71, %73, %cst_66 {dimension_numbers = #tpu.dot_dimension_numbers<[1], [0], [0], [1], [0, 0, 1, 1], [], []>} : vector<16x128xf32>, vector<128x128xf32>, vector<16x128xf32> -> vector<16x128xf32>
    %75 = arith.addf %55, %74 : vector<16x128xf32>
    %c1_67 = arith.constant 1 : index
    %c0_68 = arith.constant 0 : index
    %c0_69 = arith.constant 0 : index
    %76 = vector.load %arg3[%c1_67, %c0_68, %c0_69] : memref<3x16x16xf32, #tpu.memory_space<vmem>>, vector<1x16x16xf32>
    %77 = vector.shape_cast %76 : vector<1x16x16xf32> to vector<16x16xf32>
    %cst_70 = arith.constant dense<0.000000e+00> : vector<16x128xf32>
    %78 = tpu.matmul %77, %68, %cst_70 {dimension_numbers = #tpu.dot_dimension_numbers<[1], [0], [0], [1], [0, 0, 1, 1], [], []>} : vector<16x16xf32>, vector<16x128xf32>, vector<16x128xf32> -> vector<16x128xf32>
    %c1_71 = arith.constant 1 : index
    %c0_72 = arith.constant 0 : index
    %c0_73 = arith.constant 0 : index
    %79 = vector.load %arg8[%c1_71, %c0_72, %c0_73] : memref<3x128x128xf32, #tpu.memory_space<vmem>>, vector<1x128x128xf32>
    %80 = vector.shape_cast %79 : vector<1x128x128xf32> to vector<128x128xf32>
    %cst_74 = arith.constant dense<0.000000e+00> : vector<16x128xf32>
    %81 = tpu.matmul %78, %80, %cst_74 {dimension_numbers = #tpu.dot_dimension_numbers<[1], [0], [0], [1], [0, 0, 1, 1], [], []>} : vector<16x128xf32>, vector<128x128xf32>, vector<16x128xf32> -> vector<16x128xf32>
    %82 = arith.addf %75, %81 : vector<16x128xf32>
    %c2_75 = arith.constant 2 : index
    %c0_76 = arith.constant 0 : index
    %c0_77 = arith.constant 0 : index
    %83 = vector.load %arg3[%c2_75, %c0_76, %c0_77] : memref<3x16x16xf32, #tpu.memory_space<vmem>>, vector<1x16x16xf32>
    %84 = vector.shape_cast %83 : vector<1x16x16xf32> to vector<16x16xf32>
    %cst_78 = arith.constant dense<0.000000e+00> : vector<16x128xf32>
    %85 = tpu.matmul %84, %68, %cst_78 {dimension_numbers = #tpu.dot_dimension_numbers<[1], [0], [0], [1], [0, 0, 1, 1], [], []>} : vector<16x16xf32>, vector<16x128xf32>, vector<16x128xf32> -> vector<16x128xf32>
    %c2_79 = arith.constant 2 : index
    %c0_80 = arith.constant 0 : index
    %c0_81 = arith.constant 0 : index
    %86 = vector.load %arg8[%c2_79, %c0_80, %c0_81] : memref<3x128x128xf32, #tpu.memory_space<vmem>>, vector<1x128x128xf32>
    %87 = vector.shape_cast %86 : vector<1x128x128xf32> to vector<128x128xf32>
    %cst_82 = arith.constant dense<0.000000e+00> : vector<16x128xf32>
    %88 = tpu.matmul %85, %87, %cst_82 {dimension_numbers = #tpu.dot_dimension_numbers<[1], [0], [0], [1], [0, 0, 1, 1], [], []>} : vector<16x128xf32>, vector<128x128xf32>, vector<16x128xf32> -> vector<16x128xf32>
    %89 = arith.addf %82, %88 : vector<16x128xf32>
    %90 = math.tanh %89 : vector<16x128xf32>
    %91 = arith.mulf %67, %3 : vector<16x128xf32>
    %cst_83 = arith.constant 1.000000e+00 : f32
    %92 = vector.broadcast %cst_83 : f32 to vector<16x128xf32>
    %93 = arith.subf %92, %67 : vector<16x128xf32>
    %94 = arith.mulf %93, %90 : vector<16x128xf32>
    %95 = arith.addf %91, %94 : vector<16x128xf32>
    %c0_84 = arith.constant 0 : index
    %c0_85 = arith.constant 0 : index
    %c0_86 = arith.constant 0 : index
    %96 = vector.load %arg10[%c0_84, %c0_85, %c0_86] : memref<1x16x128xf32, #tpu.memory_space<vmem>>, vector<1x16x128xf32>
    %97 = vector.shape_cast %96 : vector<1x16x128xf32> to vector<16x128xf32>
    %98 = vector.shape_cast %95 : vector<16x128xf32> to vector<1x16x128xf32>
    tpu.vector_store %arg10[%c0_84, %c0_85, %c0_86], %98 {strides = array<i32>} : memref<1x16x128xf32, #tpu.memory_space<vmem>>, vector<1x16x128xf32>,
    return
  }
  func.func @transform_0(%arg0: i32) -> (i32, i32, i32) {
    %c0_i32 = arith.constant 0 : i32
    %c0_i32_0 = arith.constant 0 : i32
    %c0_i32_1 = arith.constant 0 : i32
    return %arg0, %c0_i32, %c0_i32_0 : i32, i32, i32
  }
  func.func @transform_1(%arg0: i32) -> (i32, i32, i32) {
    %c0_i32 = arith.constant 0 : i32
    %c0_i32_0 = arith.constant 0 : i32
    %c0_i32_1 = arith.constant 0 : i32
    return %arg0, %c0_i32, %c0_i32_0 : i32, i32, i32
  }
  func.func @transform_2(%arg0: i32) -> (i32, i32, i32) {
    %c0_i32 = arith.constant 0 : i32
    %c0_i32_0 = arith.constant 0 : i32
    %c0_i32_1 = arith.constant 0 : i32
    %c0_i32_2 = arith.constant 0 : i32
    return %c0_i32, %c0_i32_0, %c0_i32_1 : i32, i32, i32
  }
  func.func @transform_3(%arg0: i32) -> (i32, i32, i32) {
    %c0_i32 = arith.constant 0 : i32
    %c0_i32_0 = arith.constant 0 : i32
    %c0_i32_1 = arith.constant 0 : i32
    %c0_i32_2 = arith.constant 0 : i32
    return %c0_i32, %c0_i32_0, %c0_i32_1 : i32, i32, i32
  }
  func.func @transform_4(%arg0: i32) -> (i32, i32, i32) {
    %c0_i32 = arith.constant 0 : i32
    %c0_i32_0 = arith.constant 0 : i32
    %c0_i32_1 = arith.constant 0 : i32
    %c0_i32_2 = arith.constant 0 : i32
    return %c0_i32, %c0_i32_0, %c0_i32_1 : i32, i32, i32
  }
  func.func @transform_5(%arg0: i32) -> (i32, i32) {
    %c0_i32 = arith.constant 0 : i32
    %c0_i32_0 = arith.constant 0 : i32
    %c0_i32_1 = arith.constant 0 : i32
    return %c0_i32, %c0_i32_0 : i32, i32
  }
  func.func @transform_6(%arg0: i32) -> (i32, i32, i32) {
    %c0_i32 = arith.constant 0 : i32
    %c0_i32_0 = arith.constant 0 : i32
    %c0_i32_1 = arith.constant 0 : i32
    %c0_i32_2 = arith.constant 0 : i32
    return %c0_i32, %c0_i32_0, %c0_i32_1 : i32, i32, i32
  }
  func.func @transform_7(%arg0: i32) -> (i32, i32, i32) {
    %c0_i32 = arith.constant 0 : i32
    %c0_i32_0 = arith.constant 0 : i32
    %c0_i32_1 = arith.constant 0 : i32
    %c0_i32_2 = arith.constant 0 : i32
    return %c0_i32, %c0_i32_0, %c0_i32_1 : i32, i32, i32
  }
  func.func @transform_8(%arg0: i32) -> (i32, i32) {
    %c0_i32 = arith.constant 0 : i32
    %c0_i32_0 = arith.constant 0 : i32
    %c0_i32_1 = arith.constant 0 : i32
    return %c0_i32, %c0_i32_0 : i32, i32
  }
  func.func @transform_9(%arg0: i32) -> (i32, i32, i32) {
    %c0_i32 = arith.constant 0 : i32
    %c0_i32_0 = arith.constant 0 : i32
    %c0_i32_1 = arith.constant 0 : i32
    return %arg0, %c0_i32, %c0_i32_0 : i32, i32, i32
  }
}

</mosaic_0001>

<bundles_post_ra>
// kernel: tpu_custom_call.1
= control target key start
LH: loop header
LB: loop body
LE: loop exit
PB: predicated region body
PF: predicated region fallthrough
CT: control target
= control target key end

     0   :  { %s4165_s0 = inlined_call_operand.hbm [shape: f32[2,16,16], index: 0, kind: input, shape index: {}]   ;;  %s4166_s1 = inlined_call_operand.hbm [shape: f32[2,16,128], index: 1, kind: input, shape index: {}]   ;;  %s4167_s2 = inlined_call_operand.hbm [shape: f32[3,16,16], index: 2, kind: input, shape index: {}]   ;;  %s4168_s3 = inlined_call_operand.hbm [shape: f32[3,16,256], index: 3, kind: input, shape index: {}]   ;;  %s4169_s4 = inlined_call_operand.hbm [shape: f32[3,128,256], index: 4, kind: input, shape index: {}]   ;;  %s4170_s5 = inlined_call_operand.vmem [shape: f32[1,256], index: 5, kind: input, shape index: {}]   ;;  %s4171_s6 = inlined_call_operand.hbm [shape: f32[3,16,128], index: 6, kind: input, shape index: {}]   ;;  %s4172_s7 = inlined_call_operand.hbm [shape: f32[3,128,128], index: 7, kind: input, shape index: {}]   ;;  %s4173_s8 = inlined_call_operand.vmem [shape: f32[1,128], index: 8, kind: input, shape index: {}]   ;;  %s4174_s9 = inlined_call_operand.hbm [shape: f32[2,16,128], index: 9, kind: output, shape index: {}]  }
   0x1   :  { %4185 = sst [smem:[#allocation22_spill]] %s4165_s0 }
   0x2   :  { %4186 = sst [smem:[#allocation23_spill]] %s4167_s2 }
   0x3   :  { %4187 = sst [smem:[#allocation24_spill]] %s4168_s3 }
   0x4   :  { %4188 = sst [smem:[#allocation25_spill]] %s4169_s4 }
   0x5   :  { %4189 = sst [smem:[#allocation26_spill]] %s4171_s6 }
   0x6   :  { %4190 = sst [smem:[#allocation27_spill]] %s4172_s7 }
   0x7   :  { %4191 = sst [smem:[#allocation28_spill]] %s4174_s9 }
   0x8   :  { %14 = vsyncpa [#allocation3], 0 }
   0x9   :  { %16 = vsyncpa [#allocation3 + $0x1], 0 }
   0xa   :  { %17 = vsyncpa [#allocation6], 0 }
   0xb   :  { %19 = vsyncpa [#allocation6 + $0x1], 0 }
   0xc   :  { %20 = vsyncpa [#allocation9], 0 }
   0xd   :  { %21 = vsyncpa [#allocation12], 0 }
   0xe   :  { %22 = vsyncpa [#allocation4], 0 }
   0xf   :  { %24 = vsyncpa [#allocation4 + $0x1], 0  ;;  %s3642_s30 = smov 0   ;;  %s3644_s10 = smov 0  }
  0x10   :  { %s3646_s11 = smov 0   ;;  %s3648_s12 = smov 0  }
  0x11 LB: > { %s3577_s13 = smov [#allocation7]   ;;  %s3663_s15 = sadd.s32 4294967295, %s3575_s12   ;;  %s3575_s12 = sphi %s3648_s12, %s4226_s12   ;;  %s3571_s11 = sphi %s3646_s11, %s4225_s11   ;;  %s3567_s10 = sphi %s3644_s10, %s4224_s10   ;;  %s3563_s30 = sphi %s3642_s30, %s4223_s30  }
  0x12   : > { %s272_s14 = sshll.u32 %s3577_s13, 4  ;;  %p2520_p0 = scmp.ge.s32.totalorder %s3575_s12, 1  ;;  %s3668_s14 = int_to_ptr.vmem [resolvable:$true] %s272_s14 }
  0x13   : > { %p4178_p1 = scmp.eq.s32.totalorder %s3663_s15, 0  ;;  %p260_p2 = scmp.lt.s32.totalorder %s3575_s12, 3 }
  0x14   : > { %s3578_s17 = smov [#allocation8]   ;;  %s3579_s20 = smov [#allocation11]  }
  0x15   : > { %p3670_p3 = pnand %p2520_p0, %p260_p2  ;;  %s285_s18 = sshll.u32 %s3578_s17, 4  ;;  %s3683_s18 = int_to_ptr.vmem [resolvable:$true] %s285_s18 }
  0x16   : > { %s3685_s21 = sshll.u32 %s3579_s20, 4  ;;  %s4194_s2 = sld [smem:[#allocation23_spill]]  ;;  %s315_s21 = int_to_ptr.vmem [resolvable:$true] %s3685_s21 }
  0x17   : > { %s4192_s16 = scalar_select %p3670_p3, 1, 0 }
  0x18   : > { %p3190_p5 = pneg %p3670_p3 }
  0x1a   : > { %p3679_p6 = pnand %p3190_p5, %p4178_p1 }
  0x1c   : > { %s3293_s24 = scalar_lea.hbm %s4194_s2, 768  ;;  %p3695_p8 = pneg %p3679_p6 }
  0x1d   : > { %p3294_p7 = scmp.ne.s32.totalorder %s4194_s2, %s3293_s24  ;;  %p3300_p11 = scmp.lt.u32.totalorder %s3293_s24, %s4194_s2 }
  0x1f   : > { %p3296_p9 = pnand %p3695_p8, %p3294_p7 }
  0x21   : > { %p3297_p10 = pneg %p3296_p9 }
  0x23   : > { %p3302_p12 = pnand %p3300_p11, %p3297_p10 }
  0x25   : > { %3305 = shalt.err (!%p3302_p12)
}
  0x26   : > { %s3306_s13 = scalar_lea.vmem %s3668_s14, 768  ;;  %p3314_p5 = scmp.lt.s32.totalorder %s3668_s14, %s3668_s14 }
  0x27   : > { %p3307_p13 = scmp.ne.s32.totalorder %s3668_s14, %s3306_s13  ;;  %p3315_p4 = scmp.lt.s32.totalorder %s3306_s13, %s3306_s13 }
  0x29   : > { %p3309_p0 = pnand %p3307_p13, %p3695_p8  ;;  %p3316_p7 = por %p3315_p4, %p3314_p5 }
  0x2b   : > { %p3310_p2 = pneg %p3309_p0 }
  0x2d   : > { %p3317_p9 = pnand %p3316_p7, %p3310_p2 }
  0x2f   : > { %3320 = shalt.err (!%p3317_p9)
}
  0x30   : > { %s4176_s17 = smov 128   ;;  %s4182_s20 = smov 8  }
  0x31   : > { %3193 = dma.hbm_to_vmem [thread:$0]  (!%p3679_p6), %s4194_s2, 768, %s3668_s14, [#allocation6], %s4176_s17, %s4176_s17, %s4182_s20  }
  0x32   : > { %s4196_s3 = sld [smem:[#allocation24_spill]] }
  0x38   : > { %s3321_s26 = scalar_lea.hbm %s4196_s3, 1536 }
  0x39   : > { %p3322_p4 = scmp.ne.s32.totalorder %s4196_s3, %s3321_s26  ;;  %p3328_p12 = scmp.lt.u32.totalorder %s3321_s26, %s4196_s3 }
  0x3b   : > { %p3324_p10 = pnand %p3322_p4, %p3695_p8 }
  0x3d   : > { %p3325_p11 = pneg %p3324_p10 }
  0x3f   : > { %p3330_p13 = pnand %p3328_p12, %p3325_p11 }
  0x41   : > { %3333 = shalt.err (!%p3330_p13)
}
  0x42   : > { %s3334_s14 = scalar_lea.vmem %s3683_s18, 1536  ;;  %p3342_p7 = scmp.lt.s32.totalorder %s3683_s18, %s3683_s18 }
  0x43   : > { %p3335_p0 = scmp.ne.s32.totalorder %s3683_s18, %s3334_s14  ;;  %p3343_p9 = scmp.lt.s32.totalorder %s3334_s14, %s3334_s14 }
  0x45   : > { %p3337_p2 = pnand %p3335_p0, %p3695_p8  ;;  %p3344_p4 = por %p3343_p9, %p3342_p7 }
  0x47   : > { %p3338_p5 = pneg %p3337_p2 }
  0x49   : > { %p3345_p10 = pnand %p3344_p4, %p3338_p5 }
  0x4b   : > { %3348 = shalt.err (!%p3345_p10)
}
  0x4c   : > { %s4180_s22 = smov 256   ;;  %s4181_s9 = smov 16  }
  0x4d   : > { %3196 = dma.hbm_to_vmem [thread:$0]  (!%p3679_p6), %s4196_s3, 1536, %s3683_s18, [#allocation9], %s4180_s22, %s4180_s22, %s4181_s9  }
  0x4e   : > { %s4197_s6 = sld [smem:[#allocation26_spill]] }
  0x54   : > { %s3349_s28 = scalar_lea.hbm %s4197_s6, 768 }
  0x55   : > { %p3350_p11 = scmp.ne.s32.totalorder %s4197_s6, %s3349_s28  ;;  %p3356_p0 = scmp.lt.u32.totalorder %s3349_s28, %s4197_s6 }
  0x57   : > { %p3352_p12 = pnand %p3350_p11, %p3695_p8 }
  0x59   : > { %p3353_p13 = pneg %p3352_p12 }
  0x5b   : > { %p3358_p2 = pnand %p3356_p0, %p3353_p13 }
  0x5d   : > { %3361 = shalt.err (!%p3358_p2)
}
  0x5e   : > { %s3362_s23 = scalar_lea.vmem %s315_s21, 768  ;;  %p3370_p4 = scmp.lt.s32.totalorder %s315_s21, %s315_s21 }
  0x5f   : > { %p3363_p5 = scmp.ne.s32.totalorder %s315_s21, %s3362_s23  ;;  %p3371_p10 = scmp.lt.s32.totalorder %s3362_s23, %s3362_s23 }
  0x61   : > { %p3365_p7 = pnand %p3363_p5, %p3695_p8  ;;  %p3372_p1 = por %p3371_p10, %p3370_p4 }
  0x63   : > { %p3366_p9 = pneg %p3365_p7 }
  0x65   : > { %p3373_p3 = pnand %p3372_p1, %p3366_p9 }
  0x67   : > { %3376 = shalt.err (!%p3373_p3)
}
  0x68   : > { %s4198_s18 = smov 128   ;;  %s3584_s25 = smov [#allocation10]  }
  0x69   : > { %3202 = dma.hbm_to_vmem [thread:$0]  (!%p3679_p6), %s4197_s6, 768, %s315_s21, [#allocation12], %s4198_s18, %s4198_s18, %s4182_s20  }
  0x6a   : > { %s298_s26 = sshll.u32 %s3584_s25, 4  ;;  %s3585_s28 = smov [#allocation13]   ;;  %s299_s26 = int_to_ptr.vmem [resolvable:$true] %s298_s26 }
  0x6b   : > { %s327_s29 = sshll.u32 %s3585_s28, 4  ;;  %s4199_s4 = sld [smem:[#allocation25_spill]]  ;;  %s328_s29 = int_to_ptr.vmem [resolvable:$true] %s327_s29 }
  0x71   : > { %s3377_s23 = scalar_lea.hbm %s4199_s4, 12288 }
  0x72   : > { %p3378_p1 = scmp.ne.s32.totalorder %s4199_s4, %s3377_s23  ;;  %p3384_p12 = scmp.lt.u32.totalorder %s3377_s23, %s4199_s4 }
  0x74   : > { %p3380_p3 = pnand %p3378_p1, %p3695_p8 }
  0x76   : > { %p3381_p11 = pneg %p3380_p3 }
  0x78   : > { %p3386_p13 = pnand %p3384_p12, %p3381_p11 }
  0x7a   : > { %3389 = shalt.err (!%p3386_p13)
}
  0x7b   : > { %s3390_s21 = scalar_lea.vmem %s299_s26, 12288  ;;  %p3398_p7 = scmp.lt.s32.totalorder %s299_s26, %s299_s26 }
  0x7c   : > { %p3391_p0 = scmp.ne.s32.totalorder %s299_s26, %s3390_s21  ;;  %p3399_p9 = scmp.lt.s32.totalorder %s3390_s21, %s3390_s21 }
  0x7e   : > { %p3393_p2 = pnand %p3391_p0, %p3695_p8  ;;  %p3400_p4 = por %p3399_p9, %p3398_p7 }
  0x80   : > { %p3394_p5 = pneg %p3393_p2 }
  0x82   : > { %p3401_p10 = pnand %p3400_p4, %p3394_p5 }
  0x84   : > { %3404 = shalt.err (!%p3401_p10)
}
  0x85   : > { %s4200_s22 = smov 16   ;;  %s4201_s9 = smov 256  }
  0x86   : > { %3199 = dma.hbm_to_vmem [thread:$0]  (!%p3679_p6), %s4199_s4, 12288, %s299_s26, [#allocation9], %s4201_s9, %s4201_s9, %s4200_s22  }
  0x87   : > { %s4202_s7 = sld [smem:[#allocation27_spill]] }
  0x8d   : > { %s3405_s13 = scalar_lea.hbm %s4202_s7, 6144 }
  0x8e   : > { %p3406_p1 = scmp.ne.s32.totalorder %s4202_s7, %s3405_s13  ;;  %p3412_p12 = scmp.lt.u32.totalorder %s3405_s13, %s4202_s7 }
  0x90   : > { %p3408_p3 = pnand %p3406_p1, %p3695_p8 }
  0x92   : > { %p3409_p11 = pneg %p3408_p3 }
  0x94   : > { %p3414_p13 = pnand %p3412_p12, %p3409_p11 }
  0x96   : > { %3417 = shalt.err (!%p3414_p13)
}
  0x97   : > { %s3418_s2 = scalar_lea.vmem %s328_s29, 6144  ;;  %p3426_p7 = scmp.lt.s32.totalorder %s328_s29, %s328_s29 }
  0x98   : > { %p3419_p0 = scmp.ne.s32.totalorder %s328_s29, %s3418_s2  ;;  %p3427_p9 = scmp.lt.s32.totalorder %s3418_s2, %s3418_s2 }
  0x9a   : > { %p3421_p2 = pnand %p3419_p0, %p3695_p8  ;;  %p3428_p4 = por %p3427_p9, %p3426_p7 }
  0x9c   : > { %p3422_p5 = pneg %p3421_p2 }
  0x9e   : > { %p3429_p10 = pnand %p3428_p4, %p3422_p5 }
  0xa0   : > { %3432 = shalt.err (!%p3429_p10)
}
  0xa1   : > { %3205 = dma.hbm_to_vmem [thread:$0]  (!%p3679_p6), %s4202_s7, 6144, %s328_s29, [#allocation12], %s4198_s18, %s4198_s18, %s4182_s20  }
  0xa2   : > { %s2519_s19 = sadd.s32 4294967294, %s3575_s12   ;;  %s3811_s27 = sadd.s32 1, %s3575_s12  }
  0xa3   : > { %s37_s9 = sadd.s32 1, %s3571_s11  ;;  %s34_s24 = ssub.s32 %s3575_s12, %s3811_s27 }
  0xa4   : > { %p44_p8 = scmp.ne.s32.totalorder %s3571_s11, %s3567_s10  ;;  %p35_p1 = scmp.eq.s32.totalorder %s34_s24, 0 }
  0xa5   : > { %p45_p3 = scmp.eq.s32.totalorder %s3575_s12, 0  ;;  %p50_p11 = scmp.ne.s32.totalorder %s3567_s10, %s3563_s30 }
  0xa6   : > { %p247_p12 = scmp.eq.s32.totalorder %s3663_s15, 1  ;;  %p4204_p0 = scmp.eq.s32.totalorder %s3663_s15, 0 }
  0xa7   : > { %s3823_s25 = scalar_select %p35_p1, %s3571_s11, %s37_s9  }
  0xa8   : > { %p46_p13 = por %p45_p3, %p44_p8  ;;  %p3827_p2 = por %p4204_p0, %p50_p11 }
  0xa9   : > { %4203 = sst [smem:[#allocation21_spill]] %s3823_s25  ;;  %p3831_p6 = por %p247_p12, %p44_p8 }
  0xaa   : > { %p253_p5 = scmp.eq.s32.totalorder %s2519_s19, 1  ;;  %p3222_p7 = scmp.lt.s32.totalorder %s3575_s12, 2 }
  0xab   : > { %s4206_s29 = scalar_select %p3831_p6, 1, 0 }
  0xac   : > { %s344_s13 = sand.u32 1, %s3571_s11   ;;  %p3837_p9 = por %p253_p5, %p50_p11 }
  0xad   : > { %s3841_s23 = sshll.u32 %s344_s13, 4  ;;  %s2582_s17 = sshll.u32 %s3575_s12, 8 }
  0xae   : > { %s4207_s14 = scalar_select %p3837_p9, 1, 0 }
  0xaf   : > { %s4208_s0 = sld [smem:[#allocation22_spill]]  ;;  %s348_s22 = scalar_lea.vmem [#allocation2], %s3841_s23 }
  0xb0   : > { %s355_s19 = sshll.u32 %s348_s22, 4  ;;  %p3850_p4 = pnand %p3222_p7, %p46_p13  ;;  %s3854_s19 = int_to_ptr.vmem [resolvable:$true] %s355_s19 }
  0xb1   : > { %s3859_s21 = scalar_lea.hbm %s4166_s1, %s2582_s17  ;;  %s3861_s2 = scalar_lea.sflag [#allocation3], %s344_s13 }
  0xb2   : > { %p3435_p8 = pneg %p3850_p4 }
  0xb5   : > { %s3847_s26 = scalar_lea.hbm %s4208_s0, %s2582_s17  ;;  %s3438_s6 = scalar_lea.hbm %s4208_s0, 512 }
  0xb6   : > { %s3433_s3 = scalar_lea.hbm %s3847_s26, 256  ;;  %p3439_p11 = scmp.lt.u32.totalorder %s3847_s26, %s4208_s0 }
  0xb7   : > { %p3434_p10 = scmp.ne.s32.totalorder %s3847_s26, %s3433_s3  ;;  %p3440_p12 = scmp.lt.u32.totalorder %s3438_s6, %s3433_s3 }
  0xb8   : > { %p3442_p0 = scmp.lt.u32.totalorder %s3433_s3, %s3847_s26 }
  0xb9   : > { %p3436_p1 = pnand %p3435_p8, %p3434_p10  ;;  %p3441_p13 = por %p3440_p12, %p3439_p11 }
  0xbb   : > { %p3437_p3 = pneg %p3436_p1  ;;  %p3443_p5 = por %p3442_p0, %p3441_p13 }
  0xbd   : > { %p3444_p7 = pnand %p3443_p5, %p3437_p3 }
  0xbf   : > { %3447 = shalt.err (!%p3444_p7)
}
  0xc0   : > { %s3448_s20 = scalar_lea.vmem %s3854_s19, 256  ;;  %s3586_s4 = smov [#allocation2]  }
  0xc1   : > { %p3449_p10 = scmp.ne.s32.totalorder %s3854_s19, %s3448_s20  ;;  %s3453_s13 = sshll.u32 %s3586_s4, 4  ;;  %s3454_s13 = int_to_ptr.vmem [resolvable:$false] %s3453_s13 }
  0xc2   : > { %s3455_s7 = scalar_lea.vmem %s3454_s13, 512  ;;  %p3456_p6 = scmp.lt.s32.totalorder %s3854_s19, %s3454_s13 }
  0xc3   : > { %p3451_p1 = pnand %p3449_p10, %p3435_p8  ;;  %p3457_p11 = scmp.lt.s32.totalorder %s3455_s7, %s3448_s20 }
  0xc5   : > { %p3452_p9 = pneg %p3451_p1  ;;  %p3458_p12 = por %p3457_p11, %p3456_p6 }
  0xc7   : > { %p3459_p13 = pnand %p3458_p12, %p3452_p9 }
  0xc9   : > { %3462 = shalt.err (!%p3459_p13)
}
  0xca   : > { %s4210_s3 = smov 8   ;;  %s369_s6 = scalar_lea.vmem [#allocation5], %s3841_s23 }
  0xcb   : > { %3209 = dma.hbm_to_vmem [thread:$0]  (!%p3850_p4), %s3847_s26, 256, %s3854_s19, %s3861_s2, %s4198_s18, %s4198_s18, %s4210_s3  }
  0xcc   : > { %s376_s25 = sshll.u32 %s369_s6, 4  ;;  %s365_s17 = sand.u32 1, %s3575_s12   ;;  %s3894_s25 = int_to_ptr.vmem [resolvable:$true] %s376_s25 }
  0xcd   : > { %s3896_s24 = scalar_lea.sflag [#allocation6], %s365_s17  ;;  %s3463_s22 = scalar_lea.hbm %s3859_s21, 256 }
  0xce   : > { %p3464_p6 = scmp.ne.s32.totalorder %s3859_s21, %s3463_s22  ;;  %s3468_s13 = scalar_lea.hbm %s4166_s1, 512 }
  0xcf   : > { %p3469_p0 = scmp.lt.u32.totalorder %s3859_s21, %s4166_s1  ;;  %p3470_p5 = scmp.lt.u32.totalorder %s3468_s13, %s3463_s22 }
  0xd0   : > { %p3466_p9 = pnand %p3464_p6, %p3435_p8  ;;  %p3472_p10 = scmp.lt.u32.totalorder %s3463_s22, %s3859_s21 }
  0xd1   : > { %p3471_p7 = por %p3470_p5, %p3469_p0 }
  0xd2   : > { %p3467_p3 = pneg %p3466_p9 }
  0xd3   : > { %p3473_p1 = por %p3472_p10, %p3471_p7 }
  0xd5   : > { %p3474_p11 = pnand %p3473_p1, %p3467_p3 }
  0xd7   : > { %3477 = shalt.err (!%p3474_p11)
}
  0xd8   : > { %s3478_s23 = scalar_lea.vmem %s3894_s25, 256  ;;  %s3587_s26 = smov [#allocation5]  }
  0xd9   : > { %p3479_p12 = scmp.ne.s32.totalorder %s3894_s25, %s3478_s23  ;;  %s3483_s19 = sshll.u32 %s3587_s26, 4  ;;  %s3484_s19 = int_to_ptr.vmem [resolvable:$false] %s3483_s19 }
  0xda   : > { %s3485_s0 = scalar_lea.vmem %s3484_s19, 512  ;;  %p3486_p9 = scmp.lt.s32.totalorder %s3894_s25, %s3484_s19 }
  0xdb   : > { %p3481_p13 = pnand %p3479_p12, %p3435_p8  ;;  %p3487_p0 = scmp.lt.s32.totalorder %s3485_s0, %s3478_s23 }
  0xdd   : > { %p3482_p6 = pneg %p3481_p13  ;;  %p3488_p5 = por %p3487_p0, %p3486_p9 }
  0xdf   : > { %p3489_p7 = pnand %p3488_p5, %p3482_p6 }
  0xe1   : > { %3492 = shalt.err (!%p3489_p7)
}
  0xe2   : > { %3212 = dma.hbm_to_vmem [thread:$0]  (!%p3850_p4), %s3859_s21, 256, %s3894_s25, %s3896_s24, %s4198_s18, %s4198_s18, %s4210_s3  }
  0xe3   : > { %p4211_p8 = scmp.ne.s32.totalorder %s4192_s16, 0 }
  0xe4   : > { %s3928_s2 = sand.u32 (!%p4211_p8), 1, %s3567_s10  }
  0xe5   : > { %388 = sbr.rel (%p4211_p8) target bundleno = 1867 (0x74b), region = 56  ;;  %s3931_s6 = sshll.u32 (!%p4211_p8), %s3928_s2, 4 }
  0xe6   : > { %s391_s9 = scalar_lea.sflag (!%p4211_p8), [#allocation3], %s3928_s2  ;;  %s394_s17 = scalar_lea.vmem (!%p4211_p8), [#allocation2], %s3931_s6 }
  0xec   : > { %3538 = dma.done.wait (%p3827_p2), %s391_s9, 256  }
  0xed   : > { %3540 = vsyncadd (%p3827_p2), %s391_s9, 4294967040  ;;  %s399_s16 = sand.u32 1, %s3663_s15   ;;  %s403_s21 = scalar_lea.vmem [#allocation5], %s3931_s6 }
  0xee   : > { %s400_s18 = scalar_lea.sflag [#allocation6], %s399_s16 }
  0xef   : > { %3542 = dma.done.wait (%p3827_p2), %s400_s18, 256  }
  0xf0   : > { %3544 = vsyncadd (%p3827_p2), %s400_s18, 4294967040  ;;  %p4212_p4 = scmp.eq.s32.totalorder %s3663_s15, 0 }
  0xf2   : > { %3546 = dma.done.wait (%p4212_p4), [#allocation6], 768   ;;  %p4213_p3 = pmov %p4212_p4 }
  0xf4   : > { %3548 = vsyncadd (%p4213_p3), [#allocation6], 4294966528  ;;  %p4214_p10 = pmov %p4213_p3 }
  0xf5   : > { %p4215_p1 = pmov %p4213_p3 }
  0xf6   : > { %3550 = dma.done.wait (%p4214_p10), [#allocation9], 13824  }
  0xf7   : > { %3552 = vsyncadd (%p4215_p1), [#allocation9], 4294953472  ;;  %p4216_p11 = pmov %p4215_p1 }
  0xf8   : > { %p4217_p12 = pmov %p4215_p1 }
  0xf9   : > { %3554 = dma.done.wait (%p4216_p11), [#allocation12], 6912  }
  0xfa   : > { %3556 = vsyncadd (%p4217_p12), [#allocation12], 4294960384  ;;  %vm471_vm0 = vcmask 130048   ;;  %v463_v0 = vld [vmem:[%s394_s17] sm:$0xff]  ;;  %v464_v1 = vld [vmem:[%s394_s17 + $0x8] sm:$0xff]  ;;  %v3588_v22 = vmov 0.0  }
  0xfb   : > { %v3957_v2 = vld [vmem:[#allocation7] sm:$0xff]  ;;  %v3959_v3 = vpack.c.bf16 %v464_v1, %v463_v0  ;;  %v3963_v4 = vld [vmem:[#allocation7 + $0x10] sm:$0xff]  ;;  %v3969_v6 = vld [vmem:[%s403_s21 + $0x8] sm:$0xff]  ;;  %s2584_s22 = sshll.u32 %s3663_s15, 8  ;;  %s462_s20 = scalar_lea.vmem [#allocation14], %s3931_s6 }
  0xfc   : > { %2691 = vmatprep.mubr.msk.f32.mxu0 %vm471_vm0, %v3957_v2  ;;  %2712 = vmatprep.mubr.msk.f32.mxu1 %vm471_vm0, %v3963_v4  ;;  %v3967_v5 = vld [vmem:[%s403_s21] sm:$0xff]  ;;  %v3973_v7 = vld [vmem:[#allocation7 + $0x8] sm:$0xff]  ;;  %v629_v9 = vld [vmem:[#allocation8 + $0x8] sm:$0xff]  ;;  %s2376_s4 = sshll.u32 %s462_s20, 4  ;;  %s4218_s23 = sld [smem:[#allocation28_spill]]  ;;  %s4121_s4 = int_to_ptr.vmem [resolvable:$true] %s2376_s4 }
  0xfd   : > { %2877 = vmatprep.subr.bf16.mxu0 %v3959_v3  ;;  %2925 = vmatprep.subr.bf16.mxu1 %v3959_v3  ;;  %v3977_v8 = vpack.c.bf16 %v3969_v6, %v3967_v5  ;;  %v631_v10 = vld [vmem:[#allocation8 + $0x18] sm:$0xff]  ;;  %v3981_v11 = vld [vmem:[#allocation7 + $0x18] sm:$0xff]  ;;  %v1294_v12 = vld [vmem:[#allocation11 + $0x10] sm:$0xff]  ;;  %s2363_s15 = scalar_lea.sflag [#allocation4], %s3928_s2  ;;  %s3493_s19 = scalar_lea.vmem %s4121_s4, 256 }
  0xfe   : > { %2879 = vmatpush3.bf16.msra.mxu0 %v3959_v3  ;;  %2927 = vmatpush3.bf16.msra.mxu1 %v3959_v3  ;;  %v1295_v13 = vld [vmem:[#allocation11 + $0x18] sm:$0xff]  ;;  %v628_v14 = vld [vmem:[#allocation8] sm:$0xff]  ;;  %v630_v15 = vld [vmem:[#allocation8 + $0x10] sm:$0xff]  ;;  %v2884_v16 = vpack.c.bf16 %v631_v10, %v629_v9  ;;  %p3494_p2 = scmp.ne.s32.totalorder %s4121_s4, %s3493_s19  ;;  %p4219_p13 = scmp.ne.s32.totalorder %s4206_s29, 0 }
  0xff   : > { %2881 = vmatprep.subr.bf16.mxu0 %v3977_v8  ;;  %2929 = vmatprep.subr.bf16.mxu1 %v3977_v8  ;;  %v2968_v17 = vpack.c.bf16 %v1295_v13, %v1294_v12  ;;  %v2886_v18 = vpack.c.bf16 %v630_v15, %v628_v14  ;;  %v731_v19 = vld [vmem:[#allocation10 + $0x8] sm:$0xff]  ;;  %v733_v20 = vld [vmem:[#allocation10 + $0x18] sm:$0xff]  ;;  %v730_v23 = vld [vmem:[#allocation10] sm:$0xff]  ;;  %s3589_s0 = smov [#allocation14]  }
 0x100   : > { %v2888_v21 = vpack.c.bf16 %v733_v20, %v731_v19  ;;  %v732_v24 = vld [vmem:[#allocation10 + $0x10] sm:$0xff]  ;;  %v735_v25 = vld [vmem:[#allocation10 + $0x28] sm:$0xff]  ;;  %v737_v26 = vld [vmem:[#allocation10 + $0x38] sm:$0xff]  ;;  %p3495_p6 = pnand %p3494_p2, %p4219_p13  ;;  %s3497_s6 = sshll.u32 %s3589_s0, 4  ;;  %s3498_s6 = int_to_ptr.vmem [resolvable:$false] %s3497_s6 }
 0x101   : > { %2692 = vmatmul.mubr.msk.f32.vlgmr.msra.gmra.mrb[0].mxu0 %vm471_vm0, %v3973_v7  ;;  %2713 = vmatmul.mubr.msk.f32.vlgmr.msra.gmra.mrb[0].mxu1 %vm471_vm0, %v3981_v11  ;;  %v2890_v27 = vpack.c.bf16 %v732_v24, %v730_v23  ;;  %v2892_v30 = vpack.c.bf16 %v737_v26, %v735_v25  ;;  %v734_v31 = vld [vmem:[#allocation10 + $0x20] sm:$0xff]  ;;  %v736_v32 = vld [vmem:[#allocation10 + $0x30] sm:$0xff]  ;;  %v739_v35 = vld [vmem:[#allocation10 + $0x48] sm:$0xff]  ;;  %s3499_s9 = scalar_lea.vmem %s3498_s6, 512  ;;  %p3500_p0 = scmp.lt.s32.totalorder %s4121_s4, %s3498_s6 }
 0x102   : > { %2883 = vmatpush3.bf16.msra.mxu0 %v3977_v8  ;;  %2698 = vmatprep.mubr.msk.f32.mxu0 %vm471_vm0, %v3957_v2  ;;  %v741_v36 = vld [vmem:[#allocation10 + $0x58] sm:$0xff]  ;;  %v4013_v37 = vld [vmem:[#allocation7 + $0x20] sm:$0xff]  ;;  %v2894_v38 = vpack.c.bf16 %v736_v32, %v734_v31  ;;  %v1739_v39 = vld [vmem:[#allocation11 + $0x20] sm:$0xff]  ;;  %s4119_s26 = scalar_lea.hbm %s4218_s23, %s2584_s22  ;;  %p3496_p9 = pneg %p3495_p6 }
 0x103   : > { %2931 = vmatpush3.bf16.msra.mxu1 %v3977_v8  ;;  %2719 = vmatprep.mubr.msk.f32.mxu1 %vm471_vm0, %v3963_v4  ;;  %v1740_v40 = vld [vmem:[#allocation11 + $0x28] sm:$0xff]  ;;  %v4018_v41 = vld [vmem:[#allocation7 + $0x28] sm:$0xff]  ;;  %v2896_v42 = vpack.c.bf16 %v741_v36, %v739_v35  ;;  %v738_v43 = vld [vmem:[#allocation10 + $0x40] sm:$0xff]  ;;  %p3501_p5 = scmp.lt.s32.totalorder %s3499_s9, %s3493_s19 }
 0x104   : > { %2885 = vmatprep.subr.bf16.mxu0 %v2884_v16  ;;  %2969 = vmatprep.subr.bf16.mxu1 %v2968_v17  ;;  %v740_v44 = vld [vmem:[#allocation10 + $0x50] sm:$0xff]  ;;  %v743_v46 = vld [vmem:[#allocation10 + $0x68] sm:$0xff]  ;;  %v745_v47 = vld [vmem:[#allocation10 + $0x78] sm:$0xff]  ;;  %v3016_v51 = vpack.c.bf16 %v1740_v40, %v1739_v39 }
 0x105   : > { %2699 = vmatmul.mubr.msk.f32.vlgmr.msra.gmra.mrb[2].mxu0 %vm471_vm0, %v3973_v7  ;;  %v2898_v52 = vpack.c.bf16 %v740_v44, %v738_v43  ;;  %v2900_v53 = vpack.c.bf16 %v745_v47, %v743_v46  ;;  %v742_v54 = vld [vmem:[#allocation10 + $0x60] sm:$0xff]  ;;  %v744_v55 = vld [vmem:[#allocation10 + $0x70] sm:$0xff]  ;;  %v747_v56 = vld [vmem:[#allocation10 + $0x88] sm:$0xff]  ;;  %p3502_p7 = por %p3501_p5, %p3500_p0 }
 0x106   : > { %2720 = vmatmul.mubr.msk.f32.vlgmr.msra.gmra.mrb[2].mxu1 %vm471_vm0, %v3981_v11  ;;  %2887 = vmatpush1.bf16.msra.mxu0 %v2886_v18  ;;  %v749_v57 = vld [vmem:[#allocation10 + $0x98] sm:$0xff]  ;;  %v2902_v58 = vpack.c.bf16 %v744_v55, %v742_v54  ;;  %v746_v60 = vld [vmem:[#allocation10 + $0x80] sm:$0xff]  ;;  %v748_v61 = vld [vmem:[#allocation10 + $0x90] sm:$0xff] }
 0x107   : > { %2971 = vmatpush3.bf16.msra.mxu1 %v2968_v17  ;;  %702 = vmatprep.mubr.f32.mxu0 %v3588_v22  ;;  %v2904_v59 = vpack.c.bf16 %v749_v57, %v747_v56  ;;  %v751_v62 = vld [vmem:[#allocation10 + $0xa8] sm:$0xff]  ;;  %v753_v63 = vld [vmem:[#allocation10 + $0xb8] sm:$0xff]  ;;  %v2906_v0 = vpack.c.bf16 %v748_v61, %v746_v60  ;;  %v754_v14 = vld [vmem:[#allocation10 + $0xc0] sm:$0xff]  ;;  %p3503_p8 = pnand %p3502_p7, %p3496_p9 }
 0x108   : > { %2973 = vmatprep.subr.bf16.mxu1 %v3959_v3  ;;  %2889 = vmatprep.subr.bf16.mxu0 %v2888_v21  ;;  %v2908_v1 = vpack.c.bf16 %v753_v63, %v751_v62  ;;  %v755_v9 = vld [vmem:[#allocation10 + $0xc8] sm:$0xff]  ;;  %v757_v10 = vld [vmem:[#allocation10 + $0xd8] sm:$0xff]  ;;  %v756_v15 = vld [vmem:[#allocation10 + $0xd0] sm:$0xff] }
 0x109   : > { %v2912_v13 = vpack.c.bf16 %v757_v10, %v755_v9  ;;  %v759_v16 = vld [vmem:[#allocation10 + $0xe8] sm:$0xff]  ;;  %v761_v17 = vld [vmem:[#allocation10 + $0xf8] sm:$0xff]  ;;  %v2914_v18 = vpack.c.bf16 %v756_v15, %v754_v14  ;;  %v758_v20 = vld [vmem:[#allocation10 + $0xe0] sm:$0xff] }
 0x10a   : > { %v2916_v19 = vpack.c.bf16 %v761_v17, %v759_v16  ;;  %v760_v21 = vld [vmem:[#allocation10 + $0xf0] sm:$0xff]  ;;  %v843_v23 = vld [vmem:[#allocation11] sm:$0xff]  ;;  %v844_v24 = vld [vmem:[#allocation11 + $0x8] sm:$0xff] }
 0x10b   : > { %v2918_v25 = vpack.c.bf16 %v760_v21, %v758_v20  ;;  %v2920_v26 = vpack.c.bf16 %v844_v24, %v843_v23  ;;  %v1088_v32 = vld [vmem:[#allocation8 + $0x20] sm:$0xff]  ;;  %v1090_v35 = vld [vmem:[#allocation8 + $0x30] sm:$0xff]  ;;  %v1181_v36 = vld [vmem:[#allocation10 + $0x108] sm:$0xff] }
 0x10c   : > { %v2934_v39 = vpack.c.bf16 %v1090_v35, %v1088_v32  ;;  %v1182_v43 = vld [vmem:[#allocation10 + $0x110] sm:$0xff]  ;;  %v1185_v44 = vld [vmem:[#allocation10 + $0x128] sm:$0xff]  ;;  %v1187_v46 = vld [vmem:[#allocation10 + $0x138] sm:$0xff] }
 0x10d   : > { %v1190_v55 = vld [vmem:[#allocation10 + $0x150] sm:$0xff]  ;;  %v1193_v56 = vld [vmem:[#allocation10 + $0x168] sm:$0xff]  ;;  %v1195_v57 = vld [vmem:[#allocation10 + $0x178] sm:$0xff] }
 0x10e   : > { %v1194_v60 = vld [vmem:[#allocation10 + $0x170] sm:$0xff]  ;;  %v1197_v61 = vld [vmem:[#allocation10 + $0x188] sm:$0xff]  ;;  %v1199_v62 = vld [vmem:[#allocation10 + $0x198] sm:$0xff] }
 0x10f   : > { %v1203_v9 = vld [vmem:[#allocation10 + $0x1b8] sm:$0xff]  ;;  %v1205_v14 = vld [vmem:[#allocation10 + $0x1c8] sm:$0xff]  ;;  %v1533_v35 = vld [vmem:[#allocation8 + $0x40] sm:$0xff] }
 0x110   : > { %v1207_v15 = vld [vmem:[#allocation10 + $0x1d8] sm:$0xff]  ;;  %v1209_v20 = vld [vmem:[#allocation10 + $0x1e8] sm:$0xff] }
 0x111   : > { %v2960_v17 = vpack.c.bf16 %v1207_v15, %v1205_v14  ;;  %v1211_v21 = vld [vmem:[#allocation10 + $0x1f8] sm:$0xff]  ;;  %v1645_v14 = vld [vmem:[#allocation10 + $0x2a0] sm:$0xff]  ;;  %v1647_v15 = vld [vmem:[#allocation10 + $0x2b0] sm:$0xff] }
 0x112   : > { %v2964_v24 = vpack.c.bf16 %v1211_v21, %v1209_v20  ;;  %v1649_v20 = vld [vmem:[#allocation10 + $0x2c0] sm:$0xff]  ;;  %v1651_v21 = vld [vmem:[#allocation10 + $0x2d0] sm:$0xff] }
 0x1d4   : > { %v4001_v28 = vpop.f32.mrb[0].mxu0  ;;  %v4003_v29 = vpop.f32.mrb[0].mxu1 }
 0x1d5   : > { %v4005_v33 = vpop.f32.mrb[1].mxu0  ;;  %v4007_v34 = vpop.f32.mrb[1].mxu1 }
 0x1d6   : > { %2546 = vmatmul.mubr.msk.f32.vlgmr.msra.gmra.mrb[4].mxu0 %vm471_vm0, %v4005_v33  ;;  %2726 = vmatprep.mubr.msk.f32.mxu1 %vm471_vm0, %v4007_v34 }
 0x1d7   : > { %2891 = vmatpush1.bf16.msra.mxu0 %v2890_v27  ;;  %2727 = vmatmul.mubr.msk.f32.vlgmr.msra.gmra.mrb[4].mxu1 %vm471_vm0, %v4003_v29  ;;  %v1089_v27 = vld [vmem:[#allocation8 + $0x28] sm:$0xff] }
 0x1d8   : > { %2975 = vmatpush3.bf16.msra.mxu1 %v3959_v3  ;;  %2893 = vmatprep.subr.bf16.mxu0 %v2892_v30  ;;  %v4020_v45 = vpop.f32.mrb[2].mxu0  ;;  %v750_v3 = vld [vmem:[#allocation10 + $0xa0] sm:$0xff]  ;;  %v1091_v30 = vld [vmem:[#allocation8 + $0x38] sm:$0xff] }
 0x1d9   : > { %2733 = vmatprep.mubr.msk.f32.mxu1 %vm471_vm0, %v4013_v37  ;;  %708 = vmatprep.mubr.f32.mxu0 %v3588_v22  ;;  %v619_v48 = vpop.f32.mrb[3].mxu0  ;;  %v4025_v49 = vpop.f32.mrb[2].mxu1  ;;  %v2932_v31 = vpack.c.bf16 %v1091_v30, %v1089_v27  ;;  %v1534_v27 = vld [vmem:[#allocation8 + $0x48] sm:$0xff]  ;;  %v1536_v30 = vld [vmem:[#allocation8 + $0x58] sm:$0xff] }
 0x1da   : > { %2547 = vmatmul.mubr.msk.f32.gmra.mrb[6].mxu0 %vm471_vm0, %v4001_v28  ;;  %2977 = vmatprep.subr.bf16.mxu1 %v3977_v8  ;;  %v4030_v50 = vpop.f32.mrb[3].mxu1  ;;  %v2980_v32 = vpack.c.bf16 %v1536_v30, %v1534_v27  ;;  %v1653_v27 = vld [vmem:[#allocation10 + $0x2e0] sm:$0xff]  ;;  %v1655_v30 = vld [vmem:[#allocation10 + $0x2f0] sm:$0xff] }
 0x1db   : > { %2895 = vmatpush1.bf16.msra.mxu0 %v2894_v38  ;;  %2734 = vmatmul.mubr.msk.f32.vlgmr.msra.gmra.mrb[6].mxu1 %vm471_vm0, %v4018_v41  ;;  %v1183_v38 = vld [vmem:[#allocation10 + $0x118] sm:$0xff] }
 0x1dc   : > { %2897 = vmatprep.subr.bf16.mxu0 %v2896_v42  ;;  %826 = vmatprep.mubr.f32.mxu0 %v3588_v22  ;;  %v2936_v40 = vpack.c.bf16 %v1183_v38, %v1181_v36  ;;  %v1180_v42 = vld [vmem:[#allocation10 + $0x100] sm:$0xff]  ;;  %v1535_v36 = vld [vmem:[#allocation8 + $0x50] sm:$0xff] }
 0x1dd   : > { %2979 = vmatpush3.bf16.msra.mxu1 %v3977_v8  ;;  %2740 = vmatprep.mubr.msk.f32.mxu1 %vm471_vm0, %v4013_v37  ;;  %v752_v8 = vld [vmem:[#allocation10 + $0xb0] sm:$0xff]  ;;  %v2938_v47 = vpack.c.bf16 %v1182_v43, %v1180_v42  ;;  %v2982_v38 = vpack.c.bf16 %v1535_v36, %v1533_v35  ;;  %v1625_v43 = vld [vmem:[#allocation10 + $0x200] sm:$0xff]  ;;  %v716_v36 = vlaneseq }
 0x1de   : > { %3017 = vmatprep.subr.bf16.mxu1 %v3016_v51  ;;  %v2910_v12 = vpack.c.bf16 %v752_v8, %v750_v3  ;;  %v1198_v3 = vld [vmem:[#allocation10 + $0x190] sm:$0xff]  ;;  %v1201_v8 = vld [vmem:[#allocation10 + $0x1a8] sm:$0xff] }
 0x1df   : > { %2899 = vmatpush1.bf16.msra.mxu0 %v2898_v52  ;;  %v1189_v52 = vld [vmem:[#allocation10 + $0x148] sm:$0xff]  ;;  %v2956_v10 = vpack.c.bf16 %v1203_v9, %v1201_v8  ;;  %v1641_v9 = vld [vmem:[#allocation10 + $0x280] sm:$0xff] }
 0x1e0   : > { %2901 = vmatprep.subr.bf16.mxu0 %v2900_v53  ;;  %2741 = vmatmul.mubr.msk.f32.vlgmr.msra.gmra.mrb[8].mxu1 %vm471_vm0, %v4018_v41  ;;  %v1191_v53 = vld [vmem:[#allocation10 + $0x158] sm:$0xff] }
 0x1e1   : > { %3019 = vmatpush3.bf16.msra.mxu1 %v3016_v51  ;;  %v1184_v51 = vld [vmem:[#allocation10 + $0x120] sm:$0xff]  ;;  %v2944_v54 = vpack.c.bf16 %v1191_v53, %v1189_v52 }
 0x1e2   : > { %v1629_v52 = vld [vmem:[#allocation10 + $0x220] sm:$0xff] }
 0x1e3   : > { %2903 = vmatpush1.bf16.msra.mxu0 %v2902_v58 }
 0x1e4   : > { %2905 = vmatprep.subr.bf16.mxu0 %v2904_v59  ;;  %v2948_v59 = vpack.c.bf16 %v1195_v57, %v1193_v56  ;;  %v1635_v56 = vld [vmem:[#allocation10 + $0x250] sm:$0xff]  ;;  %v1638_v57 = vld [vmem:[#allocation10 + $0x268] sm:$0xff] }
 0x1e7   : > { %2907 = vmatpush1.bf16.msra.mxu0 %v2906_v0  ;;  %v2952_v0 = vpack.c.bf16 %v1199_v62, %v1197_v61  ;;  %v1637_v62 = vld [vmem:[#allocation10 + $0x260] sm:$0xff] }
 0x1e8   : > { %2909 = vmatprep.subr.bf16.mxu0 %v2908_v1  ;;  %v1196_v1 = vld [vmem:[#allocation10 + $0x180] sm:$0xff] }
 0x1eb   : > { %2911 = vmatpush1.bf16.msra.mxu0 %v2910_v12  ;;  %v1200_v12 = vld [vmem:[#allocation10 + $0x1a0] sm:$0xff] }
 0x1ec   : > { %2913 = vmatprep.subr.bf16.mxu0 %v2912_v13  ;;  %v1202_v13 = vld [vmem:[#allocation10 + $0x1b0] sm:$0xff] }
 0x1ed   : > { %v2958_v16 = vpack.c.bf16 %v1202_v13, %v1200_v12 }
 0x1ef   : > { %2915 = vmatpush1.bf16.msra.mxu0 %v2914_v18  ;;  %v1204_v18 = vld [vmem:[#allocation10 + $0x1c0] sm:$0xff] }
 0x1f0   : > { %2917 = vmatprep.subr.bf16.mxu0 %v2916_v19  ;;  %v1206_v19 = vld [vmem:[#allocation10 + $0x1d0] sm:$0xff] }
 0x1f1   : > { %v2962_v23 = vpack.c.bf16 %v1206_v19, %v1204_v18  ;;  %v3006_v18 = vpack.c.bf16 %v1647_v15, %v1645_v14  ;;  %v1931_v14 = vld [vmem:[#allocation13 + $0x60] sm:$0xff] }
 0x1f3   : > { %2919 = vmatpush1.bf16.msra.mxu0 %v2918_v25  ;;  %v1208_v25 = vld [vmem:[#allocation10 + $0x1e0] sm:$0xff] }
 0x1f4   : > { %2921 = vmatprep.subr.bf16.mxu0 %v2920_v26 }
 0x1f6   : > { %827 = vmatmul.mubr.f32.vlgmr.msra.gmra.mrb[4].mxu0 %v619_v48  ;;  %v2940_v48 = vpack.c.bf16 %v1187_v46, %v1185_v44  ;;  %v1627_v44 = vld [vmem:[#allocation10 + $0x210] sm:$0xff]  ;;  %v1630_v46 = vld [vmem:[#allocation10 + $0x228] sm:$0xff] }
 0x1f7   : > { %832 = vmatprep.mubr.f32.mxu0 %v3588_v22  ;;  %2923 = vmatpush3.bf16.msra.mxu0 %v2920_v26  ;;  %v1210_v26 = vld [vmem:[#allocation10 + $0x1f0] sm:$0xff] }
 0x1f8   : > { %2933 = vmatprep.subr.bf16.mxu0 %v2932_v31  ;;  %v2966_v31 = vpack.c.bf16 %v1210_v26, %v1208_v25  ;;  %v3010_v25 = vpack.c.bf16 %v1651_v21, %v1649_v20  ;;  %v2089_v20 = vld [vmem:[#allocation13 + $0x88] sm:$0xff] }
 0x1fa   : > { %833 = vmatmul.mubr.f32.gmra.mrb[6].mxu0 %v4020_v45  ;;  %v1186_v45 = vld [vmem:[#allocation10 + $0x130] sm:$0xff] }
 0x1fb   : > { %2705 = vmatprep.mubr.msk.f32.mxu0 %vm471_vm0, %v4005_v33  ;;  %v2942_v33 = vpack.c.bf16 %v1186_v45, %v1184_v51 }
 0x1fe   : > { %2706 = vmatmul.mubr.msk.f32.vlgmr.msra.gmra.mrb[8].mxu0 %vm471_vm0, %v4001_v28  ;;  %v1188_v28 = vld [vmem:[#allocation10 + $0x140] sm:$0xff] }
 0x1ff   : > { %2935 = vmatpush1.bf16.msra.mxu0 %v2934_v39  ;;  %1162 = vmatprep.mubr.f32.mxu0 %v3588_v22  ;;  %v2946_v58 = vpack.c.bf16 %v1190_v55, %v1188_v28  ;;  %v1626_v39 = vld [vmem:[#allocation10 + $0x208] sm:$0xff]  ;;  %v1633_v55 = vld [vmem:[#allocation10 + $0x240] sm:$0xff] }
 0x200   : > { %2937 = vmatprep.subr.bf16.mxu0 %v2936_v40  ;;  %v1628_v40 = vld [vmem:[#allocation10 + $0x218] sm:$0xff] }
 0x201   : > { %v2984_v42 = vpack.c.bf16 %v1628_v40, %v1626_v39  ;;  %v4076_v40 = vld [vmem:[%s4170_s5] sm:$0x3] }
 0x202   : > { %2555 = vmatmul.mubr.msk.f32.vlgmr.msra.gmra.mrb[4].mxu0 %vm471_vm0, %v4007_v34  ;;  %v1192_v34 = vld [vmem:[#allocation10 + $0x160] sm:$0xff] }
 0x203   : > { %1168 = vmatprep.mubr.f32.mxu0 %v3588_v22  ;;  %2939 = vmatpush1.bf16.msra.mxu0 %v2938_v47  ;;  %v2950_v63 = vpack.c.bf16 %v1194_v60, %v1192_v34  ;;  %v1632_v47 = vld [vmem:[#allocation10 + $0x238] sm:$0xff]  ;;  %v2994_v60 = vpack.c.bf16 %v1635_v56, %v1633_v55 }
 0x204   : > { %2941 = vmatprep.subr.bf16.mxu0 %v2940_v48  ;;  %v2986_v48 = vpack.c.bf16 %v1627_v44, %v1625_v43  ;;  %v2988_v45 = vpack.c.bf16 %v1632_v47, %v1630_v46  ;;  %v1920_v55 = vld [vmem:[#allocation13 + $0x8] sm:$0xff] }
 0x206   : > { %2556 = vmatmul.mubr.msk.f32.gmra.mrb[6].mxu0 %vm471_vm0, %v4003_v29  ;;  %v2954_v29 = vpack.c.bf16 %v1198_v3, %v1196_v1  ;;  %v1644_v1 = vld [vmem:[#allocation10 + $0x298] sm:$0xff] }
 0x207   : > { %2943 = vmatpush1.bf16.msra.mxu0 %v2942_v33  ;;  %1276 = vmatprep.mubr.f32.mxu0 %v3588_v22  ;;  %v1634_v33 = vld [vmem:[#allocation10 + $0x248] sm:$0xff] }
 0x208   : > { %2945 = vmatprep.subr.bf16.mxu0 %v2944_v54  ;;  %v1636_v54 = vld [vmem:[#allocation10 + $0x258] sm:$0xff] }
 0x209   : > { %v2992_v28 = vpack.c.bf16 %v1636_v54, %v1634_v33 }
 0x20b   : > { %2947 = vmatpush1.bf16.msra.mxu0 %v2946_v58  ;;  %v1640_v58 = vld [vmem:[#allocation10 + $0x278] sm:$0xff] }
 0x20c   : > { %2949 = vmatprep.subr.bf16.mxu0 %v2948_v59  ;;  %v2996_v61 = vpack.c.bf16 %v1640_v58, %v1638_v57 }
 0x20f   : > { %2951 = vmatpush1.bf16.msra.mxu0 %v2950_v63  ;;  %v1639_v63 = vld [vmem:[#allocation10 + $0x270] sm:$0xff] }
 0x210   : > { %2953 = vmatprep.subr.bf16.mxu0 %v2952_v0  ;;  %v1642_v0 = vld [vmem:[#allocation10 + $0x288] sm:$0xff]  ;;  %v2998_v3 = vpack.c.bf16 %v1639_v63, %v1637_v62  ;;  %v1923_v62 = vld [vmem:[#allocation13 + $0x20] sm:$0xff]  ;;  %v1924_v63 = vld [vmem:[#allocation13 + $0x28] sm:$0xff] }
 0x211   : > { %v3000_v8 = vpack.c.bf16 %v1644_v1, %v1642_v0  ;;  %v3032_v0 = vpack.c.bf16 %v1924_v63, %v1923_v62  ;;  %v1925_v1 = vld [vmem:[#allocation13 + $0x30] sm:$0xff]  ;;  %v2262_v62 = vld [vmem:[#allocation13 + $0x128] sm:$0xff] }
 0x213   : > { %2955 = vmatpush1.bf16.msra.mxu0 %v2954_v29  ;;  %v1643_v29 = vld [vmem:[#allocation10 + $0x290] sm:$0xff] }
 0x214   : > { %2957 = vmatprep.subr.bf16.mxu0 %v2956_v10  ;;  %v1648_v10 = vld [vmem:[#allocation10 + $0x2b8] sm:$0xff]  ;;  %v3002_v12 = vpack.c.bf16 %v1643_v29, %v1641_v9  ;;  %v1927_v9 = vld [vmem:[#allocation13 + $0x40] sm:$0xff] }
 0x215   : > { %v1928_v29 = vld [vmem:[#allocation13 + $0x48] sm:$0xff] }
 0x217   : > { %2959 = vmatpush1.bf16.msra.mxu0 %v2958_v16  ;;  %v1650_v16 = vld [vmem:[#allocation10 + $0x2c8] sm:$0xff] }
 0x218   : > { %2961 = vmatprep.subr.bf16.mxu0 %v2960_v17  ;;  %v1652_v17 = vld [vmem:[#allocation10 + $0x2d8] sm:$0xff] }
 0x219   : > { %v3008_v19 = vpack.c.bf16 %v1652_v17, %v1650_v16  ;;  %v1933_v16 = vld [vmem:[#allocation13 + $0x70] sm:$0xff]  ;;  %v1934_v17 = vld [vmem:[#allocation13 + $0x78] sm:$0xff] }
 0x21b   : > { %2963 = vmatpush1.bf16.msra.mxu0 %v2962_v23  ;;  %v1654_v23 = vld [vmem:[#allocation10 + $0x2e8] sm:$0xff] }
 0x21c   : > { %2965 = vmatprep.subr.bf16.mxu0 %v2964_v24  ;;  %v1656_v24 = vld [vmem:[#allocation10 + $0x2f8] sm:$0xff] }
 0x21d   : > { %v3012_v26 = vpack.c.bf16 %v1656_v24, %v1654_v23 }
 0x21f   : > { %2967 = vmatpush1.bf16.msra.mxu0 %v2966_v31  ;;  %v3014_v31 = vpack.c.bf16 %v1655_v30, %v1653_v27  ;;  %v2092_v30 = vld [vmem:[#allocation13 + $0xa0] sm:$0xff] }
 0x220   : > { %2981 = vmatprep.subr.bf16.mxu0 %v2980_v32 }
 0x222   : > { %1277 = vmatmul.mubr.f32.vlgmr.msra.gmra.mrb[4].mxu0 %v4030_v50  ;;  %v1631_v50 = vld [vmem:[#allocation10 + $0x230] sm:$0xff] }
 0x223   : > { %1282 = vmatprep.mubr.f32.mxu0 %v3588_v22  ;;  %2983 = vmatpush1.bf16.msra.mxu0 %v2982_v38  ;;  %v4070_v38 = vshrl.u32 %v716_v36, 7 }
 0x224   : > { %2985 = vmatprep.subr.bf16.mxu0 %v2984_v42 }
 0x225   : > { %v718_v39 = vsub.s32 0, %v4070_v38 }
 0x226   : > { %1283 = vmatmul.mubr.f32.gmra.mrb[6].mxu0 %v4025_v49  ;;  %v2990_v49 = vpack.c.bf16 %v1631_v50, %v1629_v52 }
 0x227   : > { %1607 = vmatprep.mubr.f32.mxu0 %v3588_v22  ;;  %v719_v42 = vrot.slane %v4076_v40, %v718_v39  ;;  %v2094_v39 = vld [vmem:[#allocation13 + $0xb0] sm:$0xff] }
 0x2ae   : > { %v2735_v51 = vpop.f32.mrb[6].mxu1 }
 0x2af   : > { %v1448_v53 = vpop.f32.mrb[7].mxu1 }
 0x2b0   : > { %2563 = vmatmul.mubr.msk.f32.vlgmr.msra.gmra.mrb[4].mxu0 %vm471_vm0, %v1448_v53  ;;  %2747 = vmatprep.mubr.msk.f32.mxu1 %vm471_vm0, %v1448_v53 }
 0x2b1   : > { %2987 = vmatpush1.bf16.msra.mxu0 %v2986_v48  ;;  %2748 = vmatmul.mubr.msk.f32.vlgmr.msra.gmra.mrb[4].mxu1 %vm471_vm0, %v2735_v51 }
 0x2b2   : > { %1613 = vmatprep.mubr.f32.mxu0 %v3588_v22  ;;  %2989 = vmatprep.subr.bf16.mxu0 %v2988_v45 }
 0x2b3   : > { %v2742_v59 = vpop.f32.mrb[8].mxu1  ;;  %2754 = vmatprep.mubr.msk.f32.mxu1 %vm471_vm0, %v3957_v2  ;;  %v1646_v2 = vld [vmem:[#allocation10 + $0x2a8] sm:$0xff] }
 0x2b4   : > { %2564 = vmatmul.mubr.msk.f32.gmra.mrb[6].mxu0 %vm471_vm0, %v2735_v51  ;;  %v1523_v34 = vpop.f32.mrb[9].mxu1  ;;  %v3004_v13 = vpack.c.bf16 %v1648_v10, %v1646_v2  ;;  %v3040_v2 = vpack.c.bf16 %v1928_v29, %v1927_v9  ;;  %v1929_v10 = vld [vmem:[#allocation13 + $0x50] sm:$0xff]  ;;  %v2268_v29 = vld [vmem:[#allocation13 + $0x158] sm:$0xff] }
 0x2b5   : > { %2991 = vmatpush1.bf16.msra.mxu0 %v2990_v49  ;;  %1721 = vmatprep.mubr.f32.mxu0 %v3588_v22  ;;  %v2267_v9 = vld [vmem:[#allocation13 + $0x150] sm:$0xff] }
 0x2b6   : > { %2993 = vmatprep.subr.bf16.mxu0 %v2992_v28  ;;  %v1919_v28 = vld [vmem:[#allocation13] sm:$0xff] }
 0x2b9   : > { %2995 = vmatpush1.bf16.msra.mxu0 %v2994_v60  ;;  %v1922_v60 = vld [vmem:[#allocation13 + $0x18] sm:$0xff] }
 0x2ba   : > { %2997 = vmatprep.subr.bf16.mxu0 %v2996_v61 }
 0x2bd   : > { %2999 = vmatpush1.bf16.msra.mxu0 %v2998_v3  ;;  %v1926_v3 = vld [vmem:[#allocation13 + $0x38] sm:$0xff] }
 0x2be   : > { %3001 = vmatprep.subr.bf16.mxu0 %v3000_v8  ;;  %v3036_v8 = vpack.c.bf16 %v1926_v3, %v1925_v1  ;;  %v2264_v1 = vld [vmem:[#allocation13 + $0x138] sm:$0xff] }
 0x2c1   : > { %3003 = vmatpush1.bf16.msra.mxu0 %v3002_v12  ;;  %v1930_v12 = vld [vmem:[#allocation13 + $0x58] sm:$0xff] }
 0x2c2   : > { %3005 = vmatprep.subr.bf16.mxu0 %v3004_v13  ;;  %v3044_v13 = vpack.c.bf16 %v1930_v12, %v1929_v10  ;;  %v2269_v10 = vld [vmem:[#allocation13 + $0x160] sm:$0xff] }
 0x2c5   : > { %3007 = vmatpush1.bf16.msra.mxu0 %v3006_v18  ;;  %v3052_v18 = vpack.c.bf16 %v1934_v17, %v1933_v16  ;;  %v722_v17 = vsub.s32 1, %v4070_v38 }
 0x2c6   : > { %3009 = vmatprep.subr.bf16.mxu0 %v3008_v19  ;;  %v2088_v19 = vld [vmem:[#allocation13 + $0x80] sm:$0xff] }
 0x2c7   : > { %v3060_v24 = vpack.c.bf16 %v2089_v20, %v2088_v19 }
 0x2c9   : > { %3011 = vmatpush1.bf16.msra.mxu0 %v3010_v25  ;;  %v2090_v25 = vld [vmem:[#allocation13 + $0x90] sm:$0xff] }
 0x2ca   : > { %3013 = vmatprep.subr.bf16.mxu0 %v3012_v26  ;;  %v2091_v26 = vld [vmem:[#allocation13 + $0x98] sm:$0xff] }
 0x2cb   : > { %v3064_v27 = vpack.c.bf16 %v2091_v26, %v2090_v25 }
 0x2cd   : > { %3015 = vmatpush1.bf16.msra.mxu0 %v3014_v31  ;;  %v2093_v31 = vld [vmem:[#allocation13 + $0xa8] sm:$0xff] }
 0x2ce   : > { %v3068_v36 = vpack.c.bf16 %v2093_v31, %v2092_v30 }
 0x2d0   : > { %1722 = vmatmul.mubr.f32.vlgmr.msra.gmra.mrb[4].mxu0 %v1523_v34  ;;  %v1921_v34 = vld [vmem:[#allocation13 + $0x10] sm:$0xff] }
 0x2d1   : > { %1727 = vmatprep.mubr.f32.mxu0 %v3588_v22  ;;  %v4066_v32 = vpop.f32.mrb[8].mxu0  ;;  %v3028_v61 = vpack.c.bf16 %v1922_v60, %v1921_v34  ;;  %v2260_v34 = vld [vmem:[#allocation13 + $0x118] sm:$0xff] }
 0x2d2   : > { %v4068_v35 = vpop.f32.mrb[9].mxu0 }
 0x2d4   : > { %1728 = vmatmul.mubr.f32.gmra.mrb[6].mxu0 %v2742_v59  ;;  %v3024_v59 = vpack.c.bf16 %v1920_v55, %v1919_v28  ;;  %v2258_v28 = vld [vmem:[#allocation13 + $0x108] sm:$0xff] }
 0x3a3   : > { %v1723_v43 = vpop.f32.mrb[4].mxu0 }
 0x3a4   : > { %v3128_v44 = vadd.f32 %v1723_v43, %v719_v42  ;;  %v4079_v22 = vpop.f32.mrb[5].mxu0 }
 0x3a6   : > { %v2567_v46 = vmul.f32 -1.442695, %v3128_v44  ;;  %v2096_v44 = vld [vmem:[#allocation13 + $0xc0] sm:$0xff] }
 0x3a7   : > { %v1729_v47 = vpop.f32.mrb[6].mxu0 }
 0x3a8   : > { %3273 = vpow2.f32 %v2567_v46  ;;  %v3130_v48 = vadd.f32 %v1729_v47, %v719_v42  ;;  %v4081_v51 = vpop.f32.mrb[7].mxu0  ;;  %v2095_v42 = vld [vmem:[#allocation13 + $0xb8] sm:$0xff]  ;;  %v2097_v46 = vld [vmem:[#allocation13 + $0xc8] sm:$0xff]  ;;  %v2098_v47 = vld [vmem:[#allocation13 + $0xd0] sm:$0xff] }
 0x3a9   : > { %v3072_v43 = vpack.c.bf16 %v2095_v42, %v2094_v39 }
 0x3aa   : > { %v2568_v45 = vmul.f32 -1.442695, %v3130_v48  ;;  %v2099_v48 = vld [vmem:[#allocation13 + $0xd8] sm:$0xff] }
 0x3ac   : > { %3275 = vpow2.f32 %v2568_v45  ;;  %v3080_v45 = vpack.c.bf16 %v2099_v48, %v2098_v47 }
 0x3b2   : > { %v3274_v52 = vpop.eup %3273 }
 0x3b3   : > { %v1824_v50 = vadd.f32 1.0, %v3274_v52  ;;  %v2100_v52 = vld [vmem:[#allocation13 + $0xe0] sm:$0xff] }
 0x3b5   : > { %3277 = vrcp.f32 %v1824_v50 }
 0x3b6   : > { %v3276_v53 = vpop.eup %3275 }
 0x3b7   : > { %v1825_v33 = vadd.f32 1.0, %v3276_v53  ;;  %v2102_v53 = vld [vmem:[#allocation13 + $0xf0] sm:$0xff] }
 0x3b9   : > { %3279 = vrcp.f32 %v1825_v33  ;;  %v2103_v33 = vld [vmem:[#allocation13 + $0xf8] sm:$0xff] }
 0x3bf   : > { %v3278_v54 = vpop.eup %3277 }
 0x3c0   : > { %v1842_v56 = vmul.f32 %v3278_v54, %v3967_v5  ;;  %v3088_v54 = vpack.c.bf16 %v2103_v33, %v2102_v53 }
 0x3c3   : > { %v3280_v49 = vpop.eup %3279 }
 0x3c4   : > { %v1843_v57 = vmul.f32 %v3280_v49, %v3969_v6  ;;  %v2257_v49 = vld [vmem:[#allocation13 + $0x100] sm:$0xff] }
 0x3c6   : > { %v4085_v58 = vpack.c.bf16 %v1843_v57, %v1842_v56  ;;  %v3096_v57 = vpack.c.bf16 %v2258_v28, %v2257_v49 }
 0x3c8   : > { %3021 = vmatprep.subr.bf16.mxu1 %v4085_v58 }
 0x3c9   : > { %3023 = vmatpush3.bf16.msra.mxu1 %v4085_v58 }
 0x3ca   : > { %3025 = vmatprep.subr.bf16.mxu1 %v3024_v59 }
 0x3cc   : > { %2755 = vmatmul.mubr.msk.f32.vlgmr.msra.gmra.mrb[10].mxu1 %vm471_vm0, %v3973_v7  ;;  %v1932_v7 = vld [vmem:[#allocation13 + $0x68] sm:$0xff] }
 0x3cd   : > { %3027 = vmatpush3.bf16.msra.mxu1 %v3024_v59  ;;  %v3048_v15 = vpack.c.bf16 %v1932_v7, %v1931_v14  ;;  %v2259_v59 = vld [vmem:[#allocation13 + $0x110] sm:$0xff]  ;;  %v2272_v14 = vld [vmem:[#allocation13 + $0x178] sm:$0xff] }
 0x3ce   : > { %3029 = vmatprep.subr.bf16.mxu1 %v3028_v61  ;;  %v3100_v60 = vpack.c.bf16 %v2260_v34, %v2259_v59 }
 0x3d1   : > { %3031 = vmatpush3.bf16.msra.mxu1 %v3028_v61  ;;  %v2261_v61 = vld [vmem:[#allocation13 + $0x120] sm:$0xff] }
 0x3d2   : > { %3033 = vmatprep.subr.bf16.mxu1 %v3032_v0  ;;  %v3104_v63 = vpack.c.bf16 %v2262_v62, %v2261_v61 }
 0x3d5   : > { %3035 = vmatpush3.bf16.msra.mxu1 %v3032_v0  ;;  %v2263_v0 = vld [vmem:[#allocation13 + $0x130] sm:$0xff] }
 0x3d6   : > { %3037 = vmatprep.subr.bf16.mxu1 %v3036_v8  ;;  %v3108_v3 = vpack.c.bf16 %v2264_v1, %v2263_v0 }
 0x3d9   : > { %3039 = vmatpush3.bf16.msra.mxu1 %v3036_v8  ;;  %v2265_v8 = vld [vmem:[#allocation13 + $0x140] sm:$0xff] }
 0x3da   : > { %3041 = vmatprep.subr.bf16.mxu1 %v3040_v2 }
 0x3dd   : > { %3043 = vmatpush3.bf16.msra.mxu1 %v3040_v2  ;;  %v3116_v2 = vpack.c.bf16 %v2268_v29, %v2267_v9 }
 0x3de   : > { %3045 = vmatprep.subr.bf16.mxu1 %v3044_v13 }
 0x3e1   : > { %3047 = vmatpush3.bf16.msra.mxu1 %v3044_v13  ;;  %v2271_v13 = vld [vmem:[#allocation13 + $0x170] sm:$0xff] }
 0x3e2   : > { %3049 = vmatprep.subr.bf16.mxu1 %v3048_v15  ;;  %v3124_v7 = vpack.c.bf16 %v2272_v14, %v2271_v13 }
 0x3e5   : > { %3051 = vmatpush3.bf16.msra.mxu1 %v3048_v15 }
 0x3e6   : > { %3053 = vmatprep.subr.bf16.mxu1 %v3052_v18 }
 0x3e9   : > { %3055 = vmatpush3.bf16.msra.mxu1 %v3052_v18  ;;  %v723_v18 = vrot.slane %v4076_v40, %v722_v17 }
 0x3ea   : > { %3057 = vmatprep.subr.bf16.mxu1 %v4085_v58 }
 0x3eb   : > { %v3131_v19 = vadd.f32 %v4081_v51, %v723_v18  ;;  %v3129_v20 = vadd.f32 %v4079_v22, %v723_v18 }
 0x49f   : > { %v2756_v21 = vpop.f32.mrb[10].mxu1 }
 0x4a0   : > { %v1910_v23 = vpop.f32.mrb[11].mxu1 }
 0x4a1   : > { %2789 = vmatprep.mubr.f32.mxu1 %v1910_v23  ;;  %v2569_v23 = vmul.f32 -1.442695, %v3129_v20 }
 0x4a2   : > { %2790 = vmatmul.mubr.f32.vlgmr.msra.gmra.mrb[4].mxu1 %v2756_v21  ;;  %v2570_v21 = vmul.f32 -1.442695, %v3131_v19 }
 0x4a3   : > { %3059 = vmatpush3.bf16.msra.mxu1 %v4085_v58  ;;  %2796 = vmatprep.mubr.msk.f32.mxu1 %vm471_vm0, %v3963_v4  ;;  %v3076_v4 = vpack.c.bf16 %v2097_v46, %v2096_v44 }
 0x4a4   : > { %3061 = vmatprep.subr.bf16.mxu1 %v3060_v24  ;;  %3281 = vpow2.f32 %v2570_v21 }
 0x4a5   : > { %3283 = vpow2.f32 %v2569_v23 }
 0x4a6   : > { %2797 = vmatmul.mubr.msk.f32.vlgmr.msra.gmra.mrb[12].mxu1 %vm471_vm0, %v3981_v11  ;;  %v2101_v11 = vld [vmem:[#allocation13 + $0xe8] sm:$0xff] }
 0x4a7   : > { %3063 = vmatpush3.bf16.msra.mxu1 %v3060_v24  ;;  %v3084_v50 = vpack.c.bf16 %v2101_v11, %v2100_v52 }
 0x4a8   : > { %3065 = vmatprep.subr.bf16.mxu1 %v3064_v27 }
 0x4ab   : > { %3067 = vmatpush3.bf16.msra.mxu1 %v3064_v27  ;;  %v2550_v27 = vld [vmem:[%s4173_s8] ss:$0 sm:$0xff] }
 0x4ac   : > { %3069 = vmatprep.subr.bf16.mxu1 %v3068_v36  ;;  %v927_v38 = vadd.f32 %v4066_v32, %v2550_v27  ;;  %v926_v40 = vadd.f32 %v2550_v27, %v4068_v35 }
 0x4ae   : > { %v3282_v24 = vpop.eup %3281 }
 0x4af   : > { %3071 = vmatpush3.bf16.msra.mxu1 %v3068_v36  ;;  %v3284_v25 = vpop.eup %3283  ;;  %v1837_v26 = vadd.f32 1.0, %v3282_v24 }
 0x4b0   : > { %3073 = vmatprep.subr.bf16.mxu1 %v3072_v43  ;;  %v1836_v30 = vadd.f32 1.0, %v3284_v25 }
 0x4b1   : > { %3285 = vrcp.f32 %v1837_v26 }
 0x4b2   : > { %3287 = vrcp.f32 %v1836_v30 }
 0x4b3   : > { %3075 = vmatpush3.bf16.msra.mxu1 %v3072_v43 }
 0x4b4   : > { %3077 = vmatprep.subr.bf16.mxu1 %v3076_v4 }
 0x4b7   : > { %3079 = vmatpush3.bf16.msra.mxu1 %v3076_v4 }
 0x4b8   : > { %3081 = vmatprep.subr.bf16.mxu1 %v3080_v45 }
 0x4bb   : > { %3083 = vmatpush3.bf16.msra.mxu1 %v3080_v45  ;;  %v3286_v39 = vpop.eup %3285 }
 0x4bc   : > { %3085 = vmatprep.subr.bf16.mxu1 %v3084_v50  ;;  %v3288_v42 = vpop.eup %3287  ;;  %v2355_v43 = vsub.f32 1.0, %v3286_v39  ;;  %v2353_v35 = vmul.f32 %v3286_v39, %v3969_v6 }
 0x4bd   : > { %v2354_v46 = vsub.f32 1.0, %v3288_v42  ;;  %v2352_v47 = vmul.f32 %v3288_v42, %v3967_v5 }
 0x4bf   : > { %3087 = vmatpush3.bf16.msra.mxu1 %v3084_v50 }
 0x4c0   : > { %3089 = vmatprep.subr.bf16.mxu1 %v3088_v54 }
 0x4c3   : > { %3091 = vmatpush3.bf16.msra.mxu1 %v3088_v54 }
 0x4c4   : > { %3093 = vmatprep.subr.bf16.mxu1 %v4085_v58 }
 0x579   : > { %v2798_v55 = vpop.f32.mrb[12].mxu1 }
 0x57a   : > { %v2078_v56 = vpop.f32.mrb[13].mxu1 }
 0x57b   : > { %2831 = vmatprep.mubr.f32.mxu1 %v2078_v56 }
 0x57c   : > { %2832 = vmatmul.mubr.f32.vlgmr.msra.gmra.mrb[4].mxu1 %v2798_v55 }
 0x57d   : > { %3095 = vmatpush3.bf16.msra.mxu1 %v4085_v58  ;;  %2838 = vmatprep.mubr.msk.f32.mxu1 %vm471_vm0, %v4013_v37  ;;  %v2266_v58 = vld [vmem:[#allocation13 + $0x148] sm:$0xff] }
 0x57e   : > { %3097 = vmatprep.subr.bf16.mxu1 %v3096_v57  ;;  %v3112_v37 = vpack.c.bf16 %v2266_v58, %v2265_v8 }
 0x580   : > { %2839 = vmatmul.mubr.msk.f32.vlgmr.msra.gmra.mrb[14].mxu1 %vm471_vm0, %v4018_v41  ;;  %v2270_v41 = vld [vmem:[#allocation13 + $0x168] sm:$0xff] }
 0x581   : > { %3099 = vmatpush3.bf16.msra.mxu1 %v3096_v57  ;;  %v3120_v12 = vpack.c.bf16 %v2270_v41, %v2269_v10 }
 0x582   : > { %3101 = vmatprep.subr.bf16.mxu1 %v3100_v60 }
 0x585   : > { %3103 = vmatpush3.bf16.msra.mxu1 %v3100_v60 }
 0x586   : > { %3105 = vmatprep.subr.bf16.mxu1 %v3104_v63 }
 0x589   : > { %3107 = vmatpush3.bf16.msra.mxu1 %v3104_v63 }
 0x58a   : > { %3109 = vmatprep.subr.bf16.mxu1 %v3108_v3 }
 0x58d   : > { %3111 = vmatpush3.bf16.msra.mxu1 %v3108_v3 }
 0x58e   : > { %3113 = vmatprep.subr.bf16.mxu1 %v3112_v37 }
 0x591   : > { %3115 = vmatpush3.bf16.msra.mxu1 %v3112_v37 }
 0x592   : > { %3117 = vmatprep.subr.bf16.mxu1 %v3116_v2 }
 0x595   : > { %3119 = vmatpush3.bf16.msra.mxu1 %v3116_v2 }
 0x596   : > { %3121 = vmatprep.subr.bf16.mxu1 %v3120_v12 }
 0x599   : > { %3123 = vmatpush3.bf16.msra.mxu1 %v3120_v12 }
 0x59a   : > { %3125 = vmatprep.subr.bf16.mxu1 %v3124_v7 }
 0x59d   : > { %3127 = vmatpush3.bf16.msra.mxu1 %v3124_v7 }
 0x653   : > { %v2840_v15 = vpop.f32.mrb[14].mxu1 }
 0x654   : > { %v2247_v16 = vpop.f32.mrb[15].mxu1 }
 0x655   : > { %2873 = vmatprep.mubr.f32.mxu1 %v2247_v16 }
 0x656   : > { %2874 = vmatmul.mubr.f32.vlgmr.msra.gmra.mrb[4].mxu1 %v2840_v15 }
 0x729   : > { %v2875_v22 = vpop.f32.mrb[4].mxu1 }
 0x72a   : > { %v3133_v51 = vadd.f32 %v2875_v22, %v927_v38  ;;  %v2339_v31 = vpop.f32.mrb[5].mxu1 }
 0x72b   : > { %v3135_v36 = vadd.f32 %v2339_v31, %v926_v40 }
 0x72c   : > { %3289 = vtanh.f32 %v3133_v51 }
 0x72d   : > { %3291 = vtanh.f32 %v3135_v36 }
 0x736   : > { %v3290_v44 = vpop.eup %3289 }
 0x737   : > { %v3292_v32 = vpop.eup %3291  ;;  %v2357_v4 = vmul.f32 %v3290_v44, %v2355_v43 }
 0x738   : > { %v2356_v48 = vmul.f32 %v3292_v32, %v2354_v46 }
 0x739   : > { %v2359_v45 = vadd.f32 %v2357_v4, %v2353_v35 }
 0x73a   : > { %v2358_v52 = vadd.f32 %v2356_v48, %v2352_v47 }
 0x73b   : > { %2361 = vst [vmem:[%s462_s20 + $0x8] sm:$0xff] %v2359_v45 }
 0x73c   : > { %2360 = vst [vmem:[%s462_s20] sm:$0xff] %v2358_v52 }
 0x73d   : > { %3506 = shalt.err (!%p3503_p8)
}
 0x73e   : > { %s3507_s17 = scalar_lea.hbm %s4119_s26, 256  ;;  %s3511_s21 = scalar_lea.hbm %s4218_s23, 512 }
 0x73f   : > { %p3508_p4 = scmp.ne.s32.totalorder %s4119_s26, %s3507_s17  ;;  %p3512_p1 = scmp.lt.u32.totalorder %s4119_s26, %s4218_s23 }
 0x740   : > { %p3513_p11 = scmp.lt.u32.totalorder %s3511_s21, %s3507_s17  ;;  %p3515_p2 = scmp.lt.u32.totalorder %s3507_s17, %s4119_s26 }
 0x741   : > { %p3509_p3 = pnand %p3508_p4, %p4219_p13 }
 0x742   : > { %p3514_p12 = por %p3513_p11, %p3512_p1 }
 0x743   : > { %p3510_p10 = pneg %p3509_p3 }
 0x744   : > { %p3516_p6 = por %p3515_p2, %p3514_p12 }
 0x746   : > { %p3517_p9 = pnand %p3516_p6, %p3510_p10 }
 0x748   : > { %3520 = shalt.err (!%p3517_p9)
}
 0x749   : > { %s3590_s25 = smov 128   ;;  %s3591_s24 = smov 8  }
 0x74a   : > { %3188 = dma.vmem_to_hbm [thread:$0]  (%p4219_p13), %s4121_s4, 256, %s4119_s26, %s2363_s15, %s3590_s25, %s3590_s25, %s3591_s24  }
 0x74b PF: > { %s2391_s22 = sand.u32 1, %s3563_s30   ;;  %p4220_p0 = scmp.ne.s32.totalorder %s4207_s14, 0 }
 0x74c   : > { %p4221_p5 = scmp.ge.s32.totalorder %s3575_s12, 2  ;;  %s2392_s20 = scalar_lea.sflag [#allocation4], %s2391_s22 }
 0x74e   : > { %p3214_p7 = pnand %p4221_p5, %p4220_p0 }
 0x750   : > { %3558 = dma.done.wait (!%p3214_p7), %s2392_s20, 256  }
 0x751   : > { %3560 = vsyncadd (!%p3214_p7), %s2392_s20, 4294967040  ;;  %s4222_s13 = sld [smem:[#allocation21_spill]]  ;;  %p27_p8 = scmp.ge.s32.totalorder %s3811_s27, 4  }
 0x752   : > { %s4223_s30 = smov %s3567_s10  ;;  %s4224_s10 = smov %s3571_s11 }
 0x753   : > { %s4226_s12 = smov %s3811_s27  ;;  %29 = sbr.rel (!%p27_p8) target bundleno = 17 (0x11), region = 144 }
 0x757   : > { %s4225_s11 = smov %s4222_s13 }
 0x75a   :  { %2397 = vsyncpa [#allocation3], 1 }
 0x75b   :  { %2399 = vsyncpa [#allocation3 + $0x1], 1 }
 0x75c   :  { %2400 = vsyncpa [#allocation6], 1 }
 0x75d   :  { %2402 = vsyncpa [#allocation6 + $0x1], 1 }
 0x75e   :  { %2403 = vsyncpa [#allocation9], 1 }
 0x75f   :  { %2404 = vsyncpa [#allocation12], 1 }
 0x760   :  { %2405 = vsyncpa [#allocation4], 1 }
 0x761   :  { %2407 = vsyncpa [#allocation4 + $0x1], 1 }

</bundles_post_ra>
